<compile_context>
chip_gen: v7x
topology: tpu7x:2x2x1
jax: 0.10.0
libtpu: 0.0.40
codegen_flags: <defaults>
</compile_context>

<pallas_src>
import math

import jax
import jax.numpy as jnp
from jax import lax
from jax.experimental import pallas as pl
from jax.experimental.pallas import tpu as pltpu

# ----------------------------- "args" config --------------------------------
SHIFT_RANGE_LON = 20.0
SHIFT_RANGE_LAT = 20.0
ROTATION_RANGE = 10.0
DAMPING = 0.1
USING_WEIGHT = True
N_ITERS = 2
LEVELS = 2
C_FEAT = 8

# utils.* stand-ins (deterministic constants)
METER_PER_PIXEL_BASE = 0.2          # utils.get_meter_per_pixel()
PROCESS_SATMAP_SIDELENGTH = 64.0    # utils.get_process_satmap_sidelength()
CAMERA_HEIGHT = 1.65                # utils.get_camera_height()


def _round_up(x, m):
    return ((x + m - 1) // m) * m


def _cdiv(a, b):
    return -(-a // b)


def _pick_tile(n_elems, cap):
    """Lane-dim tile: multiple of 128, <= cap, minimizing pad waste."""
    cap = max(128, (cap // 128) * 128)
    n_tiles = max(1, _cdiv(n_elems, cap))
    tile = _round_up(_cdiv(n_elems, n_tiles), 128)
    n_tiles = _cdiv(n_elems, tile)
    return tile, n_tiles


# =========================== Pallas kernel 1 =================================
# Synthetic per-level feature head: fused 1x1 conv for [feat | conf].
# Blocks: x [1, Cin, T] (T lane-dense), outputs [1, Cf, T] / [1, 1, T].
# K = Cin is tiny (3), so the contraction is Cin broadcast-FMAs on the VPU.
# No wrapper transposes: the [B, Cin, H*W] <-> NCHW reshapes are free.
def _feat_head_kernel(x_ref, w_ref, b_ref, f_ref, c_ref):
    x = x_ref[0]                                     # [Cin, T]
    w = w_ref[...]                                   # [Cf+1, Cin]
    cin = x.shape[0]
    acc = w[:, 0:1] * x[0:1, :]                      # [Cf+1, T]
    for c in range(1, cin):
        acc = acc + w[:, c:c + 1] * x[c:c + 1, :]
    acc = acc + b_ref[...]                           # [Cf+1, 1] broadcast over lanes
    cf = f_ref.shape[1]
    f_ref[0, :, :] = jnp.maximum(acc[:cf, :], 0.0)   # features: ReLU
    c_ref[0, :, :] = jax.nn.sigmoid(acc[cf:, :])     # confidence: sigmoid


def apply_feat_head(x_nchw, w_fused, b_fused):
    """w_fused: [Cf+1, Cin], b_fused: [Cf+1, 1] -> (feat NCHW, conf NCHW)."""
    B, Cin, H, W = x_nchw.shape
    CF = w_fused.shape[0] - 1
    N = H * W
    x = x_nchw.reshape(B, Cin, N)                    # free reshape (no transpose)

    tile_n, n_tiles = _pick_tile(N, 4096)
    n_pad = tile_n * n_tiles
    if n_pad != N:
        x = jnp.pad(x, ((0, 0), (0, 0), (0, n_pad - N)))

    feat, conf = pl.pallas_call(
        _feat_head_kernel,
        grid=(B, n_tiles),
        in_specs=[
            pl.BlockSpec((1, Cin, tile_n), lambda b, t: (b, 0, t)),
            pl.BlockSpec((CF + 1, Cin), lambda b, t: (0, 0)),
            pl.BlockSpec((CF + 1, 1), lambda b, t: (0, 0)),
        ],
        out_specs=(
            pl.BlockSpec((1, CF, tile_n), lambda b, t: (b, 0, t)),
            pl.BlockSpec((1, 1, tile_n), lambda b, t: (b, 0, t)),
        ),
        out_shape=(
            jax.ShapeDtypeStruct((B, CF, n_pad), jnp.float32),
            jax.ShapeDtypeStruct((B, 1, n_pad), jnp.float32),
        ),
        compiler_params=pltpu.CompilerParams(
            dimension_semantics=("parallel", "parallel")),
    )(x, w_fused, b_fused)

    feat = feat[:, :, :N].reshape(B, CF, H, W)       # free reshape back to NCHW
    conf = conf[:, :, :N].reshape(B, 1, H, W)
    return feat, conf


def avg_pool(x, factor):
    B, C, H, W = x.shape
    return x.reshape(B, C, H // factor, factor, W // factor, factor).mean(axis=(3, 5))


def feature_net(img, params_list):
    feats, confs = [], []
    for lvl, (wf, bf) in enumerate(params_list):
        x = avg_pool(img, 2 ** (lvl + 1))
        f, c = apply_feat_head(x, wf, bf)
        feats.append(f)
        confs.append(c)
    return feats, confs


# =========================== Pallas kernel 2 =================================
# Core LM hot path: per-batch weighted Gauss-Newton reductions
#   H = J^T diag(w) J (3x3),  g = J^T diag(w) r (3x1)   ->  fused [H | g] (3x4)
# Inputs (per (b, split, tile)):
#   jt : [3, 1, C, T]  bf16 (native [3, B, C, HW] layout, no wrapper transpose)
#   gf : [1, C, T]     bf16 projected ground feature
#   sf : [1, C, T]     bf16 satellite feature     (r = gf - sf fused in-kernel)
#   w  : [1, 1, T]     f32  confidence (broadcast across C in-kernel)
# Output block [1, 1, 3, 4] stays resident over the tile axis (accumulates in
# f32). One [3,T]x[T,4] contraction per channel (RHS = concat([J_c, r_c])).
def _lm_reduce_kernel(jt_ref, gf_ref, sf_ref, w_ref, hg_ref):
    t = pl.program_id(2)

    @pl.when(t == 0)
    def _init():
        hg_ref[...] = jnp.zeros_like(hg_ref)

    w = w_ref[0].astype(jnp.float32)                 # [1, T]
    C = gf_ref.shape[1]
    nt_dims = (((1,), (1,)), ((), ()))               # contract lanes: A @ B^T

    acc = jnp.zeros((3, 4), jnp.float32)
    for c in range(C):
        j_c = jt_ref[:, 0, c, :].astype(jnp.float32)                 # [3, T]
        r_c = (gf_ref[0, c:c + 1, :].astype(jnp.float32)
               - sf_ref[0, c:c + 1, :].astype(jnp.float32))          # [1, T]
        rhs = jnp.concatenate([j_c, r_c], axis=0)                    # [4, T]
        acc = acc + lax.dot_general(j_c * w, rhs, nt_dims,
                                    preferred_element_type=jnp.float32)
    hg_ref[0, 0, :, :] = hg_ref[0, 0, :, :] + acc


def lm_reduce(jt, gf, sf, w):
    """jt: [3,B,C,HW] bf16, gf/sf: [B,C,HW] bf16, w: [B,1,HW] f32 -> [B,3,4] f32."""
    B, C, HW = gf.shape

    # Bound per-buffer VMEM to ~2 MiB (so double-buffered inputs stay well under
    # v7x's 64 MiB / v5e's 16 MiB scoped budgets even at large C), cap tile at
    # 4096 lanes, and always pad HW to a 128-multiple tile (zero pad -> zero
    # contribution to H/g).
    col_bytes = (3 * C * jt.dtype.itemsize + C * gf.dtype.itemsize
                 + C * sf.dtype.itemsize + w.dtype.itemsize)
    cap = min(4096, max(128, ((2 * 1024 * 1024) // col_bytes)))
    tile_hw, n_tiles = _pick_tile(HW, cap)
    hw_pad = tile_hw * n_tiles
    if hw_pad != HW:
        pad = hw_pad - HW
        jt = jnp.pad(jt, ((0, 0), (0, 0), (0, 0), (0, pad)))
        gf = jnp.pad(gf, ((0, 0), (0, 0), (0, pad)))
        sf = jnp.pad(sf, ((0, 0), (0, 0), (0, pad)))
        w = jnp.pad(w, ((0, 0), (0, 0), (0, pad)))

    # Keep both TensorCores busy on dual-TC chips (v7x) when B == 1 by
    # splitting the tile range across an extra parallel axis.
    n_split = 2 if (B == 1 and n_tiles >= 2 and n_tiles % 2 == 0) else 1
    n_t = n_tiles // n_split

    hg = pl.pallas_call(
        _lm_reduce_kernel,
        grid=(B, n_split, n_t),
        in_specs=[
            pl.BlockSpec((3, 1, C, tile_hw), lambda b, s, t: (0, b, 0, s * n_t + t)),
            pl.BlockSpec((1, C, tile_hw), lambda b, s, t: (b, 0, s * n_t + t)),
            pl.BlockSpec((1, C, tile_hw), lambda b, s, t: (b, 0, s * n_t + t)),
            pl.BlockSpec((1, 1, tile_hw), lambda b, s, t: (b, 0, s * n_t + t)),
        ],
        out_specs=pl.BlockSpec((1, 1, 3, 4), lambda b, s, t: (b, s, 0, 0)),
        out_shape=jax.ShapeDtypeStruct((B, n_split, 3, 4), jnp.float32),
        compiler_params=pltpu.CompilerParams(
            dimension_semantics=("parallel", "parallel", "arbitrary")),
    )(jt, gf, sf, w)

    return hg.sum(axis=1)                                            # [B, 3, 4]


def lm_update(shift_u, shift_v, heading, grd_feat_proj, grd_conf_proj,
              sat_feat, sat_conf, dfeat_dpose, damping):
    del sat_conf  # unused (matches reference)
    _, B, C, H, W = dfeat_dpose.shape
    HW = H * W
    # Pure reshapes only -- no transposes / broadcasts of the big tensors.
    jt = dfeat_dpose.reshape(3, B, C, HW)                    # bf16
    gf = grd_feat_proj.reshape(B, C, HW)                     # bf16
    sf = sat_feat.astype(jnp.bfloat16).reshape(B, C, HW)     # bf16
    if USING_WEIGHT:
        w = grd_conf_proj.reshape(B, 1, HW).astype(jnp.float32)
    else:
        w = jnp.ones((B, 1, HW), jnp.float32)

    hg = lm_reduce(jt, gf, sf, w)                            # Pallas hot path
    hess = hg[:, :, :3]                                      # [B, 3, 3]
    g = hg[:, :, 3:]                                         # [B, 3, 1]

    hd = hess + damping.reshape(1, 1, 3) * jnp.eye(3, dtype=jnp.float32)[None]
    delta = -jnp.linalg.solve(hd, g)                         # [B, 3, 1] (f32)
    shift_u_new = shift_u + delta[:, 0:1, 0]
    shift_v_new = shift_v + delta[:, 1:2, 0]
    heading_new = heading + delta[:, 2:, 0]
    return shift_u_new, shift_v_new, heading_new


# ====================== geometric projection (JAX glue) ======================
def get_warp_sat2real(A):
    i = jnp.arange(A)
    ii, jj = jnp.meshgrid(i, i, indexing="ij")
    uv = jnp.stack([jj, ii], axis=-1).astype(jnp.float32)             # [A, A, 2]
    u0 = v0 = A // 2
    uv_center = uv - jnp.array([u0, v0], dtype=jnp.float32)
    mpp = METER_PER_PIXEL_BASE * (PROCESS_SATMAP_SIDELENGTH / A)
    R = jnp.array([[0.0, 1.0], [1.0, 0.0]], jnp.float32)
    aff = mpp * R
    XZ = jnp.einsum("ij,hwj->hwi", aff, uv_center)
    Y = jnp.zeros_like(XZ[..., 0:1])
    ones = jnp.ones_like(Y)
    return jnp.concatenate([XZ[:, :, :1], Y, XZ[:, :, 1:], ones], axis=-1)  # [A,A,4]


def seq_warp_real2camera(shift_u, shift_v, heading, XYZ_1, camera_k,
                         grd_H, grd_W, ori_grdH, ori_grdW):
    B = heading.shape[0]
    shift_u_m = SHIFT_RANGE_LON * shift_u
    shift_v_m = SHIFT_RANGE_LAT * shift_v
    h = heading * ROTATION_RANGE / 180.0 * math.pi
    cos, sin = jnp.cos(-h), jnp.sin(-h)
    zeros, _ones = jnp.zeros_like(cos), jnp.ones_like(cos)
    R = jnp.concatenate([cos, zeros, -sin, zeros, _ones, zeros, sin, zeros, cos],
                        axis=-1).reshape(B, 3, 3)
    height = CAMERA_HEIGHT * jnp.ones_like(shift_u_m)
    T = jnp.concatenate([shift_v_m, height, -shift_u_m], axis=-1)[..., None]  # [B,3,1]

    camera_k_s = jnp.concatenate(
        [camera_k[:, :1, :] * grd_W / ori_grdW,
         camera_k[:, 1:2, :] * grd_H / ori_grdH,
         camera_k[:, 2:, :]], axis=1)

    P = camera_k_s @ jnp.concatenate([R, T], axis=-1)                 # [B, 3, 4]
    uv1 = jnp.einsum("bij,hwj->bhwi", P, XYZ_1)                       # [B, A, A, 3]
    uv1_last = jnp.maximum(uv1[..., 2:], 1e-6)
    uv = uv1[..., :2] / uv1_last
    mask = uv1_last > 1e-6

    dT_dx = SHIFT_RANGE_LON * jnp.tile(jnp.array([0.0, 0.0, -1.0]).reshape(1, 3, 1), (B, 1, 1))
    dT_dy = SHIFT_RANGE_LAT * jnp.tile(jnp.array([1.0, 0.0, 0.0]).reshape(1, 3, 1), (B, 1, 1))
    T_zeros = jnp.zeros((B, 3, 1), jnp.float32)
    dR_dtheta = (ROTATION_RANGE / 180.0 * math.pi) * jnp.concatenate(
        [sin, zeros, cos, zeros, zeros, zeros, -cos, zeros, sin], axis=-1).reshape(B, 3, 3)
    R_zeros = jnp.zeros((B, 3, 3), jnp.float32)

    dP_dx = camera_k_s @ jnp.concatenate([R_zeros, dT_dx], axis=-1)
    dP_dy = camera_k_s @ jnp.concatenate([R_zeros, dT_dy], axis=-1)
    dP_dt = camera_k_s @ jnp.concatenate([dR_dtheta, T_zeros], axis=-1)

    def proj_jac(dP):
        duv1 = jnp.einsum("bij,hwj->bhwi", dP, XYZ_1)
        duv = duv1[..., 0:2] / uv1_last - uv1[..., :2] * duv1[..., 2:] / uv1_last ** 2
        return jnp.where(mask, duv, jnp.zeros_like(duv))

    return uv, proj_jac(dP_dx), proj_jac(dP_dy), proj_jac(dP_dt), mask


def grid_sample(image, optical, jac=None):
    """Bilinear sample (pixel coords, zeros padding) + jacobian chain rule."""
    # TODO(synk): XLA gather; candidate for a future Pallas DMA-gather kernel.
    B, C, IH, IW = image.shape
    ix, iy = optical[..., 0], optical[..., 1]
    ix0, iy0 = jnp.floor(ix), jnp.floor(iy)
    ix1, iy1 = ix0 + 1.0, iy0 + 1.0
    nw = (ix1 - ix) * (iy1 - iy)
    ne = (ix - ix0) * (iy1 - iy)
    sw = (ix1 - ix) * (iy - iy0)
    se = (ix - ix0) * (iy - iy0)

    def gather(yy, xx):
        valid = (xx >= 0) & (xx <= IW - 1) & (yy >= 0) & (yy <= IH - 1)
        xc = jnp.clip(xx, 0, IW - 1).astype(jnp.int32)
        yc = jnp.clip(yy, 0, IH - 1).astype(jnp.int32)
        vals = jax.vmap(lambda img, y, x: img[:, y, x])(image, yc, xc)  # [B,C,h,w]
        return vals * valid[:, None].astype(image.dtype)

    I_nw, I_ne = gather(iy0, ix0), gather(iy0, ix1)
    I_sw, I_se = gather(iy1, ix0), gather(iy1, ix1)

    out = (nw[:, None] * I_nw + ne[:, None] * I_ne +
           sw[:, None] * I_sw + se[:, None] * I_se)
    if jac is None:
        return out, None

    dout_dix = (-(iy1 - iy)[:, None] * I_nw + (iy1 - iy)[:, None] * I_ne
                - (iy - iy0)[:, None] * I_sw + (iy - iy0)[:, None] * I_se)
    dout_diy = (-(ix1 - ix)[:, None] * I_nw - (ix - ix0)[:, None] * I_ne
                + (ix1 - ix)[:, None] * I_sw + (ix - ix0)[:, None] * I_se)
    new_jac = (dout_dix[None] * jac[..., 0][:, :, None]
               + dout_diy[None] * jac[..., 1][:, :, None])            # [3,B,C,h,w]
    return out, new_jac


def project_grd_to_map(grd_f, grd_c, shift_u, shift_v, heading, camera_k,
                       sat_A, ori_grdH, ori_grdW):
    B, C, H, W = grd_f.shape
    XYZ_1 = get_warp_sat2real(sat_A)
    uv, jac_u, jac_v, jac_t, _ = seq_warp_real2camera(
        shift_u, shift_v, heading, XYZ_1, camera_k, H, W, ori_grdH, ori_grdW)
    jac = jnp.stack([jac_u, jac_v, jac_t], axis=0)                    # [3,B,A,A,2]
    grd_f_trans, new_jac = grid_sample(grd_f, uv, jac)
    grd_c_trans, _ = grid_sample(grd_c, uv)
    # Store the big tensors in bf16 (H/g accumulation stays f32 in-kernel).
    return (grd_f_trans.astype(jnp.bfloat16), grd_c_trans,
            new_jac.astype(jnp.bfloat16))


# ================================ forward ====================================
def forward(sat_map, grd_img_left, left_camera_k, sat_params, grd_params, damping):
    B, _, ori_grdH, ori_grdW = grd_img_left.shape
    sat_feat_list, sat_conf_list = feature_net(sat_map, sat_params)
    grd_feat_list, grd_conf_list = feature_net(grd_img_left, grd_params)

    shift_u = jnp.zeros((B, 1), jnp.float32)
    shift_v = jnp.zeros((B, 1), jnp.float32)
    heading = jnp.zeros((B, 1), jnp.float32)

    shift_us_all, shift_vs_all, headings_all = [], [], []
    for _ in range(N_ITERS):
        shift_us, shift_vs, headings = [], [], []
        for level in range(len(sat_feat_list)):
            sat_feat, sat_conf = sat_feat_list[level], sat_conf_list[level]
            grd_feat, grd_conf = grd_feat_list[level], grd_conf_list[level]
            A = sat_feat.shape[-1]
            grd_feat_proj, grd_conf_proj, dfeat_dpose = project_grd_to_map(
                grd_feat, grd_conf, shift_u, shift_v, heading, left_camera_k,
                A, ori_grdH, ori_grdW)
            shift_u, shift_v, heading = lm_update(
                shift_u, shift_v, heading, grd_feat_proj, grd_conf_proj,
                sat_feat, sat_conf, dfeat_dpose, damping)
            shift_us.append(shift_u[:, 0])
            shift_vs.append(shift_v[:, 0])
            headings.append(heading[:, 0])
        shift_us_all.append(jnp.stack(shift_us, axis=1))
        shift_vs_all.append(jnp.stack(shift_vs, axis=1))
        headings_all.append(jnp.stack(headings, axis=1))

    shift_lats = jnp.stack(shift_vs_all, axis=1)   # [B, N_iters, levels]
    shift_lons = jnp.stack(shift_us_all, axis=1)
    thetas = jnp.stack(headings_all, axis=1)
    # mode='test' return path
    return shift_lats[:, -1, -1], shift_lons[:, -1, -1], thetas[:, -1, -1]


# ================================ main =======================================
def make_feature_params(key, c_in, c_feat, levels):
    params = []
    for _ in range(levels):
        key, k1 = jax.random.split(key)
        w_fused = 0.3 * jax.random.normal(k1, (c_feat + 1, c_in), jnp.float32)
        b_fused = jnp.zeros((c_feat + 1, 1), jnp.float32)
        params.append((w_fused, b_fused))
    return params, key


if __name__ == "__main__":
    key = jax.random.PRNGKey(0)
    B, C_img = 2, 3
    A0 = 16                  # satellite sidelength
    grdH, grdW = 16, 32      # ground image

    key, k_sat, k_grd = jax.random.split(key, 3)
    sat_map = jax.random.normal(k_sat, (B, C_img, A0, A0), jnp.float32)
    grd_img = jax.random.normal(k_grd, (B, C_img, grdH, grdW), jnp.float32)
    camera_k = jnp.broadcast_to(
        jnp.array([[30.0, 0.0, grdW / 2.0],
                   [0.0, 30.0, grdH / 2.0],
                   [0.0, 0.0, 1.0]], jnp.float32), (B, 3, 3))

    sat_params, key = make_feature_params(key, C_img, C_FEAT, LEVELS)
    grd_params, key = make_feature_params(key, C_img, C_FEAT, LEVELS)
    damping = DAMPING * jnp.ones((1, 3), jnp.float32)   # self.damping parameter

    fwd = jax.jit(forward)
    shift_lat, shift_lon, theta = fwd(sat_map, grd_img, camera_k,
                                      sat_params, grd_params, damping)
    jax.block_until_ready((shift_lat, shift_lon, theta))
    assert shift_lat.shape == (B,) and shift_lon.shape == (B,) and theta.shape == (B,)
    print("KERNEL_OK")
</pallas_src>

<mosaic_0001>
module attributes {stable_mosaic.version = 11 : i64} {
  func.func @_feat_head_kernel(%arg0: i32, %arg1: i32, %arg2: memref<1x3x128xf32, #tpu.memory_space<vmem>>, %arg3: memref<9x3xf32, #tpu.memory_space<vmem>>, %arg4: memref<9x1xf32, #tpu.memory_space<vmem>>, %arg5: memref<1x8x128xf32, #tpu.memory_space<vmem>>, %arg6: memref<1x1x128xf32, #tpu.memory_space<vmem>>) attributes {dimension_semantics = [#tpu.dimension_semantics<parallel>, #tpu.dimension_semantics<parallel>], iteration_bounds = array<i64: 2, 1>, scalar_prefetch = 0 : i64, scratch_operands = 0 : i64, tpu.core_type = #tpu.core_type<tc>, window_params = [{transform_indices = @transform_0, window_bounds = array<i64: 1, 3, 128>}, {pipeline_mode = #tpu.pipeline_mode<synchronous>, transform_indices = @transform_1, window_bounds = array<i64: 9, 3>}, {pipeline_mode = #tpu.pipeline_mode<synchronous>, transform_indices = @transform_2, window_bounds = array<i64: 9, 1>}, {transform_indices = @transform_3, window_bounds = array<i64: 1, 8, 128>}, {transform_indices = @transform_4, window_bounds = array<i64: 1, 1, 128>}]} {
    %c0 = arith.constant 0 : index
    %c0_0 = arith.constant 0 : index
    %c0_1 = arith.constant 0 : index
    %0 = vector.load %arg2[%c0, %c0_0, %c0_1] : memref<1x3x128xf32, #tpu.memory_space<vmem>>, vector<1x3x128xf32>
    %1 = vector.shape_cast %0 : vector<1x3x128xf32> to vector<3x128xf32>
    %c0_2 = arith.constant 0 : index
    %c0_3 = arith.constant 0 : index
    %2 = vector.load %arg3[%c0_2, %c0_3] : memref<9x3xf32, #tpu.memory_space<vmem>>, vector<9x3xf32>
    %3 = vector.extract_strided_slice %2 {offsets = [0, 0], sizes = [9, 1], strides = [1, 1]} : vector<9x3xf32> to vector<9x1xf32>
    %4 = vector.extract_strided_slice %1 {offsets = [0, 0], sizes = [1, 128], strides = [1, 1]} : vector<3x128xf32> to vector<1x128xf32>
    %5 = vector.broadcast %3 : vector<9x1xf32> to vector<9x128xf32>
    %6 = vector.broadcast %4 : vector<1x128xf32> to vector<9x128xf32>
    %7 = arith.mulf %5, %6 : vector<9x128xf32>
    %8 = vector.extract_strided_slice %2 {offsets = [0, 1], sizes = [9, 1], strides = [1, 1]} : vector<9x3xf32> to vector<9x1xf32>
    %9 = vector.extract_strided_slice %1 {offsets = [1, 0], sizes = [1, 128], strides = [1, 1]} : vector<3x128xf32> to vector<1x128xf32>
    %10 = vector.broadcast %8 : vector<9x1xf32> to vector<9x128xf32>
    %11 = vector.broadcast %9 : vector<1x128xf32> to vector<9x128xf32>
    %12 = arith.mulf %10, %11 : vector<9x128xf32>
    %13 = arith.addf %7, %12 : vector<9x128xf32>
    %14 = vector.extract_strided_slice %2 {offsets = [0, 2], sizes = [9, 1], strides = [1, 1]} : vector<9x3xf32> to vector<9x1xf32>
    %15 = vector.extract_strided_slice %1 {offsets = [2, 0], sizes = [1, 128], strides = [1, 1]} : vector<3x128xf32> to vector<1x128xf32>
    %16 = vector.broadcast %14 : vector<9x1xf32> to vector<9x128xf32>
    %17 = vector.broadcast %15 : vector<1x128xf32> to vector<9x128xf32>
    %18 = arith.mulf %16, %17 : vector<9x128xf32>
    %19 = arith.addf %13, %18 : vector<9x128xf32>
    %c0_4 = arith.constant 0 : index
    %c0_5 = arith.constant 0 : index
    %20 = vector.load %arg4[%c0_4, %c0_5] : memref<9x1xf32, #tpu.memory_space<vmem>>, vector<9x1xf32>
    %21 = vector.broadcast %20 : vector<9x1xf32> to vector<9x128xf32>
    %22 = arith.addf %19, %21 : vector<9x128xf32>
    %23 = vector.extract_strided_slice %22 {offsets = [0, 0], sizes = [8, 128], strides = [1, 1]} : vector<9x128xf32> to vector<8x128xf32>
    %cst = arith.constant 0.000000e+00 : f32
    %24 = vector.broadcast %cst : f32 to vector<8x128xf32>
    %25 = arith.maximumf %23, %24 : vector<8x128xf32>
    %c0_6 = arith.constant 0 : index
    %c0_7 = arith.constant 0 : index
    %c0_8 = arith.constant 0 : index
    %26 = vector.load %arg5[%c0_6, %c0_7, %c0_8] : memref<1x8x128xf32, #tpu.memory_space<vmem>>, vector<1x8x128xf32>
    %27 = vector.shape_cast %26 : vector<1x8x128xf32> to vector<8x128xf32>
    %28 = vector.shape_cast %25 : vector<8x128xf32> to vector<1x8x128xf32>
    tpu.vector_store %arg5[%c0_6, %c0_7, %c0_8], %28 {strides = array<i32>} : memref<1x8x128xf32, #tpu.memory_space<vmem>>, vector<1x8x128xf32>,
    %29 = vector.extract_strided_slice %22 {offsets = [8, 0], sizes = [1, 128], strides = [1, 1]} : vector<9x128xf32> to vector<1x128xf32>
    %30 = arith.negf %29 : vector<1x128xf32>
    %31 = math.exp %30 : vector<1x128xf32>
    %cst_9 = arith.constant 1.000000e+00 : f32
    %32 = vector.broadcast %cst_9 : f32 to vector<1x128xf32>
    %33 = arith.addf %32, %31 : vector<1x128xf32>
    %34 = arith.divf %32, %33 : vector<1x128xf32>
    %c0_10 = arith.constant 0 : index
    %c0_11 = arith.constant 0 : index
    %c0_12 = arith.constant 0 : index
    %35 = vector.load %arg6[%c0_10, %c0_11, %c0_12] : memref<1x1x128xf32, #tpu.memory_space<vmem>>, vector<1x1x128xf32>
    %36 = vector.shape_cast %35 : vector<1x1x128xf32> to vector<1x128xf32>
    %37 = vector.shape_cast %34 : vector<1x128xf32> to vector<1x1x128xf32>
    tpu.vector_store %arg6[%c0_10, %c0_11, %c0_12], %37 {strides = array<i32>} : memref<1x1x128xf32, #tpu.memory_space<vmem>>, vector<1x1x128xf32>,
    return
  }
  func.func @transform_0(%arg0: i32, %arg1: i32) -> (i32, i32, i32) {
    %c0_i32 = arith.constant 0 : i32
    %c0_i32_0 = arith.constant 0 : i32
    return %arg0, %c0_i32, %arg1 : i32, i32, i32
  }
  func.func @transform_1(%arg0: i32, %arg1: i32) -> (i32, i32) {
    %c0_i32 = arith.constant 0 : i32
    %c0_i32_0 = arith.constant 0 : i32
    %c0_i32_1 = arith.constant 0 : i32
    return %c0_i32, %c0_i32_0 : i32, i32
  }
  func.func @transform_2(%arg0: i32, %arg1: i32) -> (i32, i32) {
    %c0_i32 = arith.constant 0 : i32
    %c0_i32_0 = arith.constant 0 : i32
    %c0_i32_1 = arith.constant 0 : i32
    return %c0_i32, %c0_i32_0 : i32, i32
  }
  func.func @transform_3(%arg0: i32, %arg1: i32) -> (i32, i32, i32) {
    %c0_i32 = arith.constant 0 : i32
    %c0_i32_0 = arith.constant 0 : i32
    return %arg0, %c0_i32, %arg1 : i32, i32, i32
  }
  func.func @transform_4(%arg0: i32, %arg1: i32) -> (i32, i32, i32) {
    %c0_i32 = arith.constant 0 : i32
    %c0_i32_0 = arith.constant 0 : i32
    return %arg0, %c0_i32, %arg1 : i32, i32, i32
  }
}

module attributes {stable_mosaic.version = 11 : i64} {
  func.func @_feat_head_kernel(%arg0: i32, %arg1: i32, %arg2: memref<1x3x128xf32, #tpu.memory_space<vmem>>, %arg3: memref<9x3xf32, #tpu.memory_space<vmem>>, %arg4: memref<9x1xf32, #tpu.memory_space<vmem>>, %arg5: memref<1x8x128xf32, #tpu.memory_space<vmem>>, %arg6: memref<1x1x128xf32, #tpu.memory_space<vmem>>) attributes {dimension_semantics = [#tpu.dimension_semantics<parallel>, #tpu.dimension_semantics<parallel>], iteration_bounds = array<i64: 2, 1>, scalar_prefetch = 0 : i64, scratch_operands = 0 : i64, tpu.core_type = #tpu.core_type<tc>, window_params = [{transform_indices = @transform_0, window_bounds = array<i64: 1, 3, 128>}, {pipeline_mode = #tpu.pipeline_mode<synchronous>, transform_indices = @transform_1, window_bounds = array<i64: 9, 3>}, {pipeline_mode = #tpu.pipeline_mode<synchronous>, transform_indices = @transform_2, window_bounds = array<i64: 9, 1>}, {transform_indices = @transform_3, window_bounds = array<i64: 1, 8, 128>}, {transform_indices = @transform_4, window_bounds = array<i64: 1, 1, 128>}]} {
    %c0 = arith.constant 0 : index
    %c0_0 = arith.constant 0 : index
    %c0_1 = arith.constant 0 : index
    %0 = vector.load %arg2[%c0, %c0_0, %c0_1] : memref<1x3x128xf32, #tpu.memory_space<vmem>>, vector<1x3x128xf32>
    %1 = vector.shape_cast %0 : vector<1x3x128xf32> to vector<3x128xf32>
    %c0_2 = arith.constant 0 : index
    %c0_3 = arith.constant 0 : index
    %2 = vector.load %arg3[%c0_2, %c0_3] : memref<9x3xf32, #tpu.memory_space<vmem>>, vector<9x3xf32>
    %3 = vector.extract_strided_slice %2 {offsets = [0, 0], sizes = [9, 1], strides = [1, 1]} : vector<9x3xf32> to vector<9x1xf32>
    %4 = vector.extract_strided_slice %1 {offsets = [0, 0], sizes = [1, 128], strides = [1, 1]} : vector<3x128xf32> to vector<1x128xf32>
    %5 = vector.broadcast %3 : vector<9x1xf32> to vector<9x128xf32>
    %6 = vector.broadcast %4 : vector<1x128xf32> to vector<9x128xf32>
    %7 = arith.mulf %5, %6 : vector<9x128xf32>
    %8 = vector.extract_strided_slice %2 {offsets = [0, 1], sizes = [9, 1], strides = [1, 1]} : vector<9x3xf32> to vector<9x1xf32>
    %9 = vector.extract_strided_slice %1 {offsets = [1, 0], sizes = [1, 128], strides = [1, 1]} : vector<3x128xf32> to vector<1x128xf32>
    %10 = vector.broadcast %8 : vector<9x1xf32> to vector<9x128xf32>
    %11 = vector.broadcast %9 : vector<1x128xf32> to vector<9x128xf32>
    %12 = arith.mulf %10, %11 : vector<9x128xf32>
    %13 = arith.addf %7, %12 : vector<9x128xf32>
    %14 = vector.extract_strided_slice %2 {offsets = [0, 2], sizes = [9, 1], strides = [1, 1]} : vector<9x3xf32> to vector<9x1xf32>
    %15 = vector.extract_strided_slice %1 {offsets = [2, 0], sizes = [1, 128], strides = [1, 1]} : vector<3x128xf32> to vector<1x128xf32>
    %16 = vector.broadcast %14 : vector<9x1xf32> to vector<9x128xf32>
    %17 = vector.broadcast %15 : vector<1x128xf32> to vector<9x128xf32>
    %18 = arith.mulf %16, %17 : vector<9x128xf32>
    %19 = arith.addf %13, %18 : vector<9x128xf32>
    %c0_4 = arith.constant 0 : index
    %c0_5 = arith.constant 0 : index
    %20 = vector.load %arg4[%c0_4, %c0_5] : memref<9x1xf32, #tpu.memory_space<vmem>>, vector<9x1xf32>
    %21 = vector.broadcast %20 : vector<9x1xf32> to vector<9x128xf32>
    %22 = arith.addf %19, %21 : vector<9x128xf32>
    %23 = vector.extract_strided_slice %22 {offsets = [0, 0], sizes = [8, 128], strides = [1, 1]} : vector<9x128xf32> to vector<8x128xf32>
    %cst = arith.constant 0.000000e+00 : f32
    %24 = vector.broadcast %cst : f32 to vector<8x128xf32>
    %25 = arith.maximumf %23, %24 : vector<8x128xf32>
    %c0_6 = arith.constant 0 : index
    %c0_7 = arith.constant 0 : index
    %c0_8 = arith.constant 0 : index
    %26 = vector.load %arg5[%c0_6, %c0_7, %c0_8] : memref<1x8x128xf32, #tpu.memory_space<vmem>>, vector<1x8x128xf32>
    %27 = vector.shape_cast %26 : vector<1x8x128xf32> to vector<8x128xf32>
    %28 = vector.shape_cast %25 : vector<8x128xf32> to vector<1x8x128xf32>
    tpu.vector_store %arg5[%c0_6, %c0_7, %c0_8], %28 {strides = array<i32>} : memref<1x8x128xf32, #tpu.memory_space<vmem>>, vector<1x8x128xf32>,
    %29 = vector.extract_strided_slice %22 {offsets = [8, 0], sizes = [1, 128], strides = [1, 1]} : vector<9x128xf32> to vector<1x128xf32>
    %30 = arith.negf %29 : vector<1x128xf32>
    %31 = math.exp %30 : vector<1x128xf32>
    %cst_9 = arith.constant 1.000000e+00 : f32
    %32 = vector.broadcast %cst_9 : f32 to vector<1x128xf32>
    %33 = arith.addf %32, %31 : vector<1x128xf32>
    %34 = arith.divf %32, %33 : vector<1x128xf32>
    %c0_10 = arith.constant 0 : index
    %c0_11 = arith.constant 0 : index
    %c0_12 = arith.constant 0 : index
    %35 = vector.load %arg6[%c0_10, %c0_11, %c0_12] : memref<1x1x128xf32, #tpu.memory_space<vmem>>, vector<1x1x128xf32>
    %36 = vector.shape_cast %35 : vector<1x1x128xf32> to vector<1x128xf32>
    %37 = vector.shape_cast %34 : vector<1x128xf32> to vector<1x1x128xf32>
    tpu.vector_store %arg6[%c0_10, %c0_11, %c0_12], %37 {strides = array<i32>} : memref<1x1x128xf32, #tpu.memory_space<vmem>>, vector<1x1x128xf32>,
    return
  }
  func.func @transform_0(%arg0: i32, %arg1: i32) -> (i32, i32, i32) {
    %c0_i32 = arith.constant 0 : i32
    %c0_i32_0 = arith.constant 0 : i32
    return %arg0, %c0_i32, %arg1 : i32, i32, i32
  }
  func.func @transform_1(%arg0: i32, %arg1: i32) -> (i32, i32) {
    %c0_i32 = arith.constant 0 : i32
    %c0_i32_0 = arith.constant 0 : i32
    %c0_i32_1 = arith.constant 0 : i32
    return %c0_i32, %c0_i32_0 : i32, i32
  }
  func.func @transform_2(%arg0: i32, %arg1: i32) -> (i32, i32) {
    %c0_i32 = arith.constant 0 : i32
    %c0_i32_0 = arith.constant 0 : i32
    %c0_i32_1 = arith.constant 0 : i32
    return %c0_i32, %c0_i32_0 : i32, i32
  }
  func.func @transform_3(%arg0: i32, %arg1: i32) -> (i32, i32, i32) {
    %c0_i32 = arith.constant 0 : i32
    %c0_i32_0 = arith.constant 0 : i32
    return %arg0, %c0_i32, %arg1 : i32, i32, i32
  }
  func.func @transform_4(%arg0: i32, %arg1: i32) -> (i32, i32, i32) {
    %c0_i32 = arith.constant 0 : i32
    %c0_i32_0 = arith.constant 0 : i32
    return %arg0, %c0_i32, %arg1 : i32, i32, i32
  }
}

module attributes {stable_mosaic.version = 11 : i64} {
  func.func @_lm_reduce_kernel(%arg0: i32, %arg1: i32, %arg2: i32, %arg3: memref<3x1x8x128xbf16, #tpu.memory_space<vmem>>, %arg4: memref<1x8x128xbf16, #tpu.memory_space<vmem>>, %arg5: memref<1x8x128xbf16, #tpu.memory_space<vmem>>, %arg6: memref<1x1x128xf32, #tpu.memory_space<vmem>>, %arg7: memref<1x1x3x4xf32, #tpu.memory_space<vmem>>) attributes {dimension_semantics = [#tpu.dimension_semantics<parallel>, #tpu.dimension_semantics<parallel>, #tpu.dimension_semantics<arbitrary>], iteration_bounds = array<i64: 2, 1, 1>, scalar_prefetch = 0 : i64, scratch_operands = 0 : i64, tpu.core_type = #tpu.core_type<tc>, window_params = [{transform_indices = @transform_0, window_bounds = array<i64: 3, 1, 8, 128>}, {transform_indices = @transform_1, window_bounds = array<i64: 1, 8, 128>}, {transform_indices = @transform_2, window_bounds = array<i64: 1, 8, 128>}, {transform_indices = @transform_3, window_bounds = array<i64: 1, 1, 128>}, {transform_indices = @transform_4, window_bounds = array<i64: 1, 1, 3, 4>}]} {
    %c0_i32 = arith.constant 0 : i32
    %0 = arith.cmpi eq, %arg2, %c0_i32 : i32
    %1 = arith.extui %0 : i1 to i32
    %c0_i32_0 = arith.constant 0 : i32
    %2 = arith.cmpi ne, %1, %c0_i32_0 : i32
    scf.if %2 {
      %cst_92 = arith.constant 0.000000e+00 : f32
      %132 = vector.broadcast %cst_92 : f32 to vector<1x1x3x4xf32>
      %c0_93 = arith.constant 0 : index
      %c0_94 = arith.constant 0 : index
      %c0_95 = arith.constant 0 : index
      %c0_96 = arith.constant 0 : index
      %133 = vector.load %arg7[%c0_93, %c0_94, %c0_95, %c0_96] : memref<1x1x3x4xf32, #tpu.memory_space<vmem>>, vector<1x1x3x4xf32>
      tpu.vector_store %arg7[%c0_93, %c0_94, %c0_95, %c0_96], %132 {strides = array<i32>} : memref<1x1x3x4xf32, #tpu.memory_space<vmem>>, vector<1x1x3x4xf32>,
    } else {
    }
    %c0 = arith.constant 0 : index
    %c0_1 = arith.constant 0 : index
    %c0_2 = arith.constant 0 : index
    %3 = vector.load %arg6[%c0, %c0_1, %c0_2] : memref<1x1x128xf32, #tpu.memory_space<vmem>>, vector<1x1x128xf32>
    %4 = vector.shape_cast %3 : vector<1x1x128xf32> to vector<1x128xf32>
    %cst = arith.constant 0.000000e+00 : f32
    %5 = vector.broadcast %cst : f32 to vector<3x4xf32>
    %c0_3 = arith.constant 0 : index
    %c0_4 = arith.constant 0 : index
    %c0_5 = arith.constant 0 : index
    %c0_6 = arith.constant 0 : index
    %6 = vector.load %arg3[%c0_3, %c0_4, %c0_5, %c0_6] : memref<3x1x8x128xbf16, #tpu.memory_space<vmem>>, vector<3x1x1x128xbf16>
    %7 = vector.shape_cast %6 : vector<3x1x1x128xbf16> to vector<3x128xbf16>
    %8 = arith.extf %7 : vector<3x128xbf16> to vector<3x128xf32>
    %c0_7 = arith.constant 0 : index
    %c0_8 = arith.constant 0 : index
    %c0_9 = arith.constant 0 : index
    %9 = vector.load %arg4[%c0_7, %c0_8, %c0_9] : memref<1x8x128xbf16, #tpu.memory_space<vmem>>, vector<1x1x128xbf16>
    %10 = vector.shape_cast %9 : vector<1x1x128xbf16> to vector<1x128xbf16>
    %11 = arith.extf %10 : vector<1x128xbf16> to vector<1x128xf32>
    %c0_10 = arith.constant 0 : index
    %c0_11 = arith.constant 0 : index
    %c0_12 = arith.constant 0 : index
    %12 = vector.load %arg5[%c0_10, %c0_11, %c0_12] : memref<1x8x128xbf16, #tpu.memory_space<vmem>>, vector<1x1x128xbf16>
    %13 = vector.shape_cast %12 : vector<1x1x128xbf16> to vector<1x128xbf16>
    %14 = arith.extf %13 : vector<1x128xbf16> to vector<1x128xf32>
    %15 = arith.subf %11, %14 : vector<1x128xf32>
    %16 = tpu.concatenate %8, %15 in 0 : vector<3x128xf32>, vector<1x128xf32> -> vector<4x128xf32>
    %17 = vector.broadcast %4 : vector<1x128xf32> to vector<3x128xf32>
    %18 = arith.mulf %8, %17 : vector<3x128xf32>
    %cst_13 = arith.constant dense<0.000000e+00> : vector<3x4xf32>
    %19 = tpu.matmul %18, %16, %cst_13 {dimension_numbers = #tpu.dot_dimension_numbers<[1], [1], [0], [0], [0, 0, 1, 0], [], []>} : vector<3x128xf32>, vector<4x128xf32>, vector<3x4xf32> -> vector<3x4xf32>
    %20 = arith.addf %5, %19 : vector<3x4xf32>
    %c0_14 = arith.constant 0 : index
    %c0_15 = arith.constant 0 : index
    %c1 = arith.constant 1 : index
    %c0_16 = arith.constant 0 : index
    %21 = vector.load %arg3[%c0_14, %c0_15, %c1, %c0_16] : memref<3x1x8x128xbf16, #tpu.memory_space<vmem>>, vector<3x1x1x128xbf16>
    %22 = vector.shape_cast %21 : vector<3x1x1x128xbf16> to vector<3x128xbf16>
    %23 = arith.extf %22 : vector<3x128xbf16> to vector<3x128xf32>
    %c0_17 = arith.constant 0 : index
    %c1_18 = arith.constant 1 : index
    %c0_19 = arith.constant 0 : index
    %24 = vector.load %arg4[%c0_17, %c1_18, %c0_19] : memref<1x8x128xbf16, #tpu.memory_space<vmem>>, vector<1x1x128xbf16>
    %25 = vector.shape_cast %24 : vector<1x1x128xbf16> to vector<1x128xbf16>
    %26 = arith.extf %25 : vector<1x128xbf16> to vector<1x128xf32>
    %c0_20 = arith.constant 0 : index
    %c1_21 = arith.constant 1 : index
    %c0_22 = arith.constant 0 : index
    %27 = vector.load %arg5[%c0_20, %c1_21, %c0_22] : memref<1x8x128xbf16, #tpu.memory_space<vmem>>, vector<1x1x128xbf16>
    %28 = vector.shape_cast %27 : vector<1x1x128xbf16> to vector<1x128xbf16>
    %29 = arith.extf %28 : vector<1x128xbf16> to vector<1x128xf32>
    %30 = arith.subf %26, %29 : vector<1x128xf32>
    %31 = tpu.concatenate %23, %30 in 0 : vector<3x128xf32>, vector<1x128xf32> -> vector<4x128xf32>
    %32 = vector.broadcast %4 : vector<1x128xf32> to vector<3x128xf32>
    %33 = arith.mulf %23, %32 : vector<3x128xf32>
    %cst_23 = arith.constant dense<0.000000e+00> : vector<3x4xf32>
    %34 = tpu.matmul %33, %31, %cst_23 {dimension_numbers = #tpu.dot_dimension_numbers<[1], [1], [0], [0], [0, 0, 1, 0], [], []>} : vector<3x128xf32>, vector<4x128xf32>, vector<3x4xf32> -> vector<3x4xf32>
    %35 = arith.addf %20, %34 : vector<3x4xf32>
    %c0_24 = arith.constant 0 : index
    %c0_25 = arith.constant 0 : index
    %c2 = arith.constant 2 : index
    %c0_26 = arith.constant 0 : index
    %36 = vector.load %arg3[%c0_24, %c0_25, %c2, %c0_26] : memref<3x1x8x128xbf16, #tpu.memory_space<vmem>>, vector<3x1x1x128xbf16>
    %37 = vector.shape_cast %36 : vector<3x1x1x128xbf16> to vector<3x128xbf16>
    %38 = arith.extf %37 : vector<3x128xbf16> to vector<3x128xf32>
    %c0_27 = arith.constant 0 : index
    %c2_28 = arith.constant 2 : index
    %c0_29 = arith.constant 0 : index
    %39 = vector.load %arg4[%c0_27, %c2_28, %c0_29] : memref<1x8x128xbf16, #tpu.memory_space<vmem>>, vector<1x1x128xbf16>
    %40 = vector.shape_cast %39 : vector<1x1x128xbf16> to vector<1x128xbf16>
    %41 = arith.extf %40 : vector<1x128xbf16> to vector<1x128xf32>
    %c0_30 = arith.constant 0 : index
    %c2_31 = arith.constant 2 : index
    %c0_32 = arith.constant 0 : index
    %42 = vector.load %arg5[%c0_30, %c2_31, %c0_32] : memref<1x8x128xbf16, #tpu.memory_space<vmem>>, vector<1x1x128xbf16>
    %43 = vector.shape_cast %42 : vector<1x1x128xbf16> to vector<1x128xbf16>
    %44 = arith.extf %43 : vector<1x128xbf16> to vector<1x128xf32>
    %45 = arith.subf %41, %44 : vector<1x128xf32>
    %46 = tpu.concatenate %38, %45 in 0 : vector<3x128xf32>, vector<1x128xf32> -> vector<4x128xf32>
    %47 = vector.broadcast %4 : vector<1x128xf32> to vector<3x128xf32>
    %48 = arith.mulf %38, %47 : vector<3x128xf32>
    %cst_33 = arith.constant dense<0.000000e+00> : vector<3x4xf32>
    %49 = tpu.matmul %48, %46, %cst_33 {dimension_numbers = #tpu.dot_dimension_numbers<[1], [1], [0], [0], [0, 0, 1, 0], [], []>} : vector<3x128xf32>, vector<4x128xf32>, vector<3x4xf32> -> vector<3x4xf32>
    %50 = arith.addf %35, %49 : vector<3x4xf32>
    %c0_34 = arith.constant 0 : index
    %c0_35 = arith.constant 0 : index
    %c3 = arith.constant 3 : index
    %c0_36 = arith.constant 0 : index
    %51 = vector.load %arg3[%c0_34, %c0_35, %c3, %c0_36] : memref<3x1x8x128xbf16, #tpu.memory_space<vmem>>, vector<3x1x1x128xbf16>
    %52 = vector.shape_cast %51 : vector<3x1x1x128xbf16> to vector<3x128xbf16>
    %53 = arith.extf %52 : vector<3x128xbf16> to vector<3x128xf32>
    %c0_37 = arith.constant 0 : index
    %c3_38 = arith.constant 3 : index
    %c0_39 = arith.constant 0 : index
    %54 = vector.load %arg4[%c0_37, %c3_38, %c0_39] : memref<1x8x128xbf16, #tpu.memory_space<vmem>>, vector<1x1x128xbf16>
    %55 = vector.shape_cast %54 : vector<1x1x128xbf16> to vector<1x128xbf16>
    %56 = arith.extf %55 : vector<1x128xbf16> to vector<1x128xf32>
    %c0_40 = arith.constant 0 : index
    %c3_41 = arith.constant 3 : index
    %c0_42 = arith.constant 0 : index
    %57 = vector.load %arg5[%c0_40, %c3_41, %c0_42] : memref<1x8x128xbf16, #tpu.memory_space<vmem>>, vector<1x1x128xbf16>
    %58 = vector.shape_cast %57 : vector<1x1x128xbf16> to vector<1x128xbf16>
    %59 = arith.extf %58 : vector<1x128xbf16> to vector<1x128xf32>
    %60 = arith.subf %56, %59 : vector<1x128xf32>
    %61 = tpu.concatenate %53, %60 in 0 : vector<3x128xf32>, vector<1x128xf32> -> vector<4x128xf32>
    %62 = vector.broadcast %4 : vector<1x128xf32> to vector<3x128xf32>
    %63 = arith.mulf %53, %62 : vector<3x128xf32>
    %cst_43 = arith.constant dense<0.000000e+00> : vector<3x4xf32>
    %64 = tpu.matmul %63, %61, %cst_43 {dimension_numbers = #tpu.dot_dimension_numbers<[1], [1], [0], [0], [0, 0, 1, 0], [], []>} : vector<3x128xf32>, vector<4x128xf32>, vector<3x4xf32> -> vector<3x4xf32>
    %65 = arith.addf %50, %64 : vector<3x4xf32>
    %c0_44 = arith.constant 0 : index
    %c0_45 = arith.constant 0 : index
    %c4 = arith.constant 4 : index
    %c0_46 = arith.constant 0 : index
    %66 = vector.load %arg3[%c0_44, %c0_45, %c4, %c0_46] : memref<3x1x8x128xbf16, #tpu.memory_space<vmem>>, vector<3x1x1x128xbf16>
    %67 = vector.shape_cast %66 : vector<3x1x1x128xbf16> to vector<3x128xbf16>
    %68 = arith.extf %67 : vector<3x128xbf16> to vector<3x128xf32>
    %c0_47 = arith.constant 0 : index
    %c4_48 = arith.constant 4 : index
    %c0_49 = arith.constant 0 : index
    %69 = vector.load %arg4[%c0_47, %c4_48, %c0_49] : memref<1x8x128xbf16, #tpu.memory_space<vmem>>, vector<1x1x128xbf16>
    %70 = vector.shape_cast %69 : vector<1x1x128xbf16> to vector<1x128xbf16>
    %71 = arith.extf %70 : vector<1x128xbf16> to vector<1x128xf32>
    %c0_50 = arith.constant 0 : index
    %c4_51 = arith.constant 4 : index
    %c0_52 = arith.constant 0 : index
    %72 = vector.load %arg5[%c0_50, %c4_51, %c0_52] : memref<1x8x128xbf16, #tpu.memory_space<vmem>>, vector<1x1x128xbf16>
    %73 = vector.shape_cast %72 : vector<1x1x128xbf16> to vector<1x128xbf16>
    %74 = arith.extf %73 : vector<1x128xbf16> to vector<1x128xf32>
    %75 = arith.subf %71, %74 : vector<1x128xf32>
    %76 = tpu.concatenate %68, %75 in 0 : vector<3x128xf32>, vector<1x128xf32> -> vector<4x128xf32>
    %77 = vector.broadcast %4 : vector<1x128xf32> to vector<3x128xf32>
    %78 = arith.mulf %68, %77 : vector<3x128xf32>
    %cst_53 = arith.constant dense<0.000000e+00> : vector<3x4xf32>
    %79 = tpu.matmul %78, %76, %cst_53 {dimension_numbers = #tpu.dot_dimension_numbers<[1], [1], [0], [0], [0, 0, 1, 0], [], []>} : vector<3x128xf32>, vector<4x128xf32>, vector<3x4xf32> -> vector<3x4xf32>
    %80 = arith.addf %65, %79 : vector<3x4xf32>
    %c0_54 = arith.constant 0 : index
    %c0_55 = arith.constant 0 : index
    %c5 = arith.constant 5 : index
    %c0_56 = arith.constant 0 : index
    %81 = vector.load %arg3[%c0_54, %c0_55, %c5, %c0_56] : memref<3x1x8x128xbf16, #tpu.memory_space<vmem>>, vector<3x1x1x128xbf16>
    %82 = vector.shape_cast %81 : vector<3x1x1x128xbf16> to vector<3x128xbf16>
    %83 = arith.extf %82 : vector<3x128xbf16> to vector<3x128xf32>
    %c0_57 = arith.constant 0 : index
    %c5_58 = arith.constant 5 : index
    %c0_59 = arith.constant 0 : index
    %84 = vector.load %arg4[%c0_57, %c5_58, %c0_59] : memref<1x8x128xbf16, #tpu.memory_space<vmem>>, vector<1x1x128xbf16>
    %85 = vector.shape_cast %84 : vector<1x1x128xbf16> to vector<1x128xbf16>
    %86 = arith.extf %85 : vector<1x128xbf16> to vector<1x128xf32>
    %c0_60 = arith.constant 0 : index
    %c5_61 = arith.constant 5 : index
    %c0_62 = arith.constant 0 : index
    %87 = vector.load %arg5[%c0_60, %c5_61, %c0_62] : memref<1x8x128xbf16, #tpu.memory_space<vmem>>, vector<1x1x128xbf16>
    %88 = vector.shape_cast %87 : vector<1x1x128xbf16> to vector<1x128xbf16>
    %89 = arith.extf %88 : vector<1x128xbf16> to vector<1x128xf32>
    %90 = arith.subf %86, %89 : vector<1x128xf32>
    %91 = tpu.concatenate %83, %90 in 0 : vector<3x128xf32>, vector<1x128xf32> -> vector<4x128xf32>
    %92 = vector.broadcast %4 : vector<1x128xf32> to vector<3x128xf32>
    %93 = arith.mulf %83, %92 : vector<3x128xf32>
    %cst_63 = arith.constant dense<0.000000e+00> : vector<3x4xf32>
    %94 = tpu.matmul %93, %91, %cst_63 {dimension_numbers = #tpu.dot_dimension_numbers<[1], [1], [0], [0], [0, 0, 1, 0], [], []>} : vector<3x128xf32>, vector<4x128xf32>, vector<3x4xf32> -> vector<3x4xf32>
    %95 = arith.addf %80, %94 : vector<3x4xf32>
    %c0_64 = arith.constant 0 : index
    %c0_65 = arith.constant 0 : index
    %c6 = arith.constant 6 : index
    %c0_66 = arith.constant 0 : index
    %96 = vector.load %arg3[%c0_64, %c0_65, %c6, %c0_66] : memref<3x1x8x128xbf16, #tpu.memory_space<vmem>>, vector<3x1x1x128xbf16>
    %97 = vector.shape_cast %96 : vector<3x1x1x128xbf16> to vector<3x128xbf16>
    %98 = arith.extf %97 : vector<3x128xbf16> to vector<3x128xf32>
    %c0_67 = arith.constant 0 : index
    %c6_68 = arith.constant 6 : index
    %c0_69 = arith.constant 0 : index
    %99 = vector.load %arg4[%c0_67, %c6_68, %c0_69] : memref<1x8x128xbf16, #tpu.memory_space<vmem>>, vector<1x1x128xbf16>
    %100 = vector.shape_cast %99 : vector<1x1x128xbf16> to vector<1x128xbf16>
    %101 = arith.extf %100 : vector<1x128xbf16> to vector<1x128xf32>
    %c0_70 = arith.constant 0 : index
    %c6_71 = arith.constant 6 : index
    %c0_72 = arith.constant 0 : index
    %102 = vector.load %arg5[%c0_70, %c6_71, %c0_72] : memref<1x8x128xbf16, #tpu.memory_space<vmem>>, vector<1x1x128xbf16>
    %103 = vector.shape_cast %102 : vector<1x1x128xbf16> to vector<1x128xbf16>
    %104 = arith.extf %103 : vector<1x128xbf16> to vector<1x128xf32>
    %105 = arith.subf %101, %104 : vector<1x128xf32>
    %106 = tpu.concatenate %98, %105 in 0 : vector<3x128xf32>, vector<1x128xf32> -> vector<4x128xf32>
    %107 = vector.broadcast %4 : vector<1x128xf32> to vector<3x128xf32>
    %108 = arith.mulf %98, %107 : vector<3x128xf32>
    %cst_73 = arith.constant dense<0.000000e+00> : vector<3x4xf32>
    %109 = tpu.matmul %108, %106, %cst_73 {dimension_numbers = #tpu.dot_dimension_numbers<[1], [1], [0], [0], [0, 0, 1, 0], [], []>} : vector<3x128xf32>, vector<4x128xf32>, vector<3x4xf32> -> vector<3x4xf32>
    %110 = arith.addf %95, %109 : vector<3x4xf32>
    %c0_74 = arith.constant 0 : index
    %c0_75 = arith.constant 0 : index
    %c7 = arith.constant 7 : index
    %c0_76 = arith.constant 0 : index
    %111 = vector.load %arg3[%c0_74, %c0_75, %c7, %c0_76] : memref<3x1x8x128xbf16, #tpu.memory_space<vmem>>, vector<3x1x1x128xbf16>
    %112 = vector.shape_cast %111 : vector<3x1x1x128xbf16> to vector<3x128xbf16>
    %113 = arith.extf %112 : vector<3x128xbf16> to vector<3x128xf32>
    %c0_77 = arith.constant 0 : index
    %c7_78 = arith.constant 7 : index
    %c0_79 = arith.constant 0 : index
    %114 = vector.load %arg4[%c0_77, %c7_78, %c0_79] : memref<1x8x128xbf16, #tpu.memory_space<vmem>>, vector<1x1x128xbf16>
    %115 = vector.shape_cast %114 : vector<1x1x128xbf16> to vector<1x128xbf16>
    %116 = arith.extf %115 : vector<1x128xbf16> to vector<1x128xf32>
    %c0_80 = arith.constant 0 : index
    %c7_81 = arith.constant 7 : index
    %c0_82 = arith.constant 0 : index
    %117 = vector.load %arg5[%c0_80, %c7_81, %c0_82] : memref<1x8x128xbf16, #tpu.memory_space<vmem>>, vector<1x1x128xbf16>
    %118 = vector.shape_cast %117 : vector<1x1x128xbf16> to vector<1x128xbf16>
    %119 = arith.extf %118 : vector<1x128xbf16> to vector<1x128xf32>
    %120 = arith.subf %116, %119 : vector<1x128xf32>
    %121 = tpu.concatenate %113, %120 in 0 : vector<3x128xf32>, vector<1x128xf32> -> vector<4x128xf32>
    %122 = vector.broadcast %4 : vector<1x128xf32> to vector<3x128xf32>
    %123 = arith.mulf %113, %122 : vector<3x128xf32>
    %cst_83 = arith.constant dense<0.000000e+00> : vector<3x4xf32>
    %124 = tpu.matmul %123, %121, %cst_83 {dimension_numbers = #tpu.dot_dimension_numbers<[1], [1], [0], [0], [0, 0, 1, 0], [], []>} : vector<3x128xf32>, vector<4x128xf32>, vector<3x4xf32> -> vector<3x4xf32>
    %125 = arith.addf %110, %124 : vector<3x4xf32>
    %c0_84 = arith.constant 0 : index
    %c0_85 = arith.constant 0 : index
    %c0_86 = arith.constant 0 : index
    %c0_87 = arith.constant 0 : index
    %126 = vector.load %arg7[%c0_84, %c0_85, %c0_86, %c0_87] : memref<1x1x3x4xf32, #tpu.memory_space<vmem>>, vector<1x1x3x4xf32>
    %127 = vector.shape_cast %126 : vector<1x1x3x4xf32> to vector<3x4xf32>
    %128 = arith.addf %127, %125 : vector<3x4xf32>
    %c0_88 = arith.constant 0 : index
    %c0_89 = arith.constant 0 : index
    %c0_90 = arith.constant 0 : index
    %c0_91 = arith.constant 0 : index
    %129 = vector.load %arg7[%c0_88, %c0_89, %c0_90, %c0_91] : memref<1x1x3x4xf32, #tpu.memory_space<vmem>>, vector<1x1x3x4xf32>
    %130 = vector.shape_cast %129 : vector<1x1x3x4xf32> to vector<3x4xf32>
    %131 = vector.shape_cast %128 : vector<3x4xf32> to vector<1x1x3x4xf32>
    tpu.vector_store %arg7[%c0_88, %c0_89, %c0_90, %c0_91], %131 {strides = array<i32>} : memref<1x1x3x4xf32, #tpu.memory_space<vmem>>, vector<1x1x3x4xf32>,
    return
  }
  func.func @transform_0(%arg0: i32, %arg1: i32, %arg2: i32) -> (i32, i32, i32, i32) {
    %c1_i32 = arith.constant 1 : i32
    %0 = arith.muli %arg1, %c1_i32 : i32
    %1 = arith.addi %0, %arg2 : i32
    %c0_i32 = arith.constant 0 : i32
    %c0_i32_0 = arith.constant 0 : i32
    %c0_i32_1 = arith.constant 0 : i32
    return %c0_i32, %arg0, %c0_i32_0, %1 : i32, i32, i32, i32
  }
  func.func @transform_1(%arg0: i32, %arg1: i32, %arg2: i32) -> (i32, i32, i32) {
    %c1_i32 = arith.constant 1 : i32
    %0 = arith.muli %arg1, %c1_i32 : i32
    %1 = arith.addi %0, %arg2 : i32
    %c0_i32 = arith.constant 0 : i32
    %c0_i32_0 = arith.constant 0 : i32
    return %arg0, %c0_i32, %1 : i32, i32, i32
  }
  func.func @transform_2(%arg0: i32, %arg1: i32, %arg2: i32) -> (i32, i32, i32) {
    %c1_i32 = arith.constant 1 : i32
    %0 = arith.muli %arg1, %c1_i32 : i32
    %1 = arith.addi %0, %arg2 : i32
    %c0_i32 = arith.constant 0 : i32
    %c0_i32_0 = arith.constant 0 : i32
    return %arg0, %c0_i32, %1 : i32, i32, i32
  }
  func.func @transform_3(%arg0: i32, %arg1: i32, %arg2: i32) -> (i32, i32, i32) {
    %c1_i32 = arith.constant 1 : i32
    %0 = arith.muli %arg1, %c1_i32 : i32
    %1 = arith.addi %0, %arg2 : i32
    %c0_i32 = arith.constant 0 : i32
    %c0_i32_0 = arith.constant 0 : i32
    return %arg0, %c0_i32, %1 : i32, i32, i32
  }
  func.func @transform_4(%arg0: i32, %arg1: i32, %arg2: i32) -> (i32, i32, i32, i32) {
    %c0_i32 = arith.constant 0 : i32
    %c0_i32_0 = arith.constant 0 : i32
    %c0_i32_1 = arith.constant 0 : i32
    return %arg0, %arg1, %c0_i32, %c0_i32_0 : i32, i32, i32, i32
  }
}

</mosaic_0001>

<bundles_post_ra>
// kernel: forward.10
= control target key start
LH: loop header
LB: loop body
LE: loop exit
PB: predicated region body
PF: predicated region fallthrough
CT: control target
= control target key end

     0   :  { %s523_s15 = smov 0   ;;  %s525_s16 = smov 0   ;;  %s580_s0 = inlined_call_operand.vmem [shape: f32[2,3,128], index: 0, kind: input, shape index: {}]   ;;  %s581_s1 = inlined_call_operand.vmem [shape: f32[9,3], index: 1, kind: input, shape index: {}]   ;;  %s582_s2 = inlined_call_operand.vmem [shape: f32[9,1], index: 2, kind: input, shape index: {}]   ;;  %s583_s3 = inlined_call_operand.vmem [shape: f32[2,8,128], index: 3, kind: output, shape index: {0}]   ;;  %s584_s4 = inlined_call_operand.vmem [shape: f32[2,1,128], index: 4, kind: output, shape index: {1}]  }
   0x1   :  { %s527_s17 = smov 0  }
   0x2 LB: > { %s27_s18 = sadd.s32 1, %s489_s16  ;;  %p428_p0 = scmp.ge.s32.totalorder %s493_s17, 1  ;;  %s493_s17 = sphi %s527_s17, %s15_s17   ;;  %s489_s16 = sphi %s525_s16, %s586_s16   ;;  %s485_s15 = sphi %s523_s15, %s585_s15  }
   0x3   : > { %p29_p1 = scmp.ge.s32.totalorder %s27_s18, 2  ;;  %p185_p2 = scmp.lt.s32.totalorder %s493_s17, 3 }
   0x5   : > { %s588_s18 = smov (%p29_p1, %s27_s18), 0  ;;  %p186_p3 = pnand %p428_p0, %p185_p2 }
   0x6   : > { %v243_v0 = vld [vmem:[%s581_s1 + $0x8] sm:$0x1] (!%p186_p3)  ;;  %v495_v1 = vmov (!%p186_p3), 2   ;;  %v496_v2 = vmov (!%p186_p3), 0   ;;  %v497_v4 = vmov (!%p186_p3), 1   ;;  %v242_v5 = vld [vmem:[%s581_s1] sm:$0xff] (!%p186_p3)  ;;  %v254_v7 = vlaneseq (!%p186_p3) }
   0x7   : > { %189 = sbr.rel (%p186_p3) target bundleno = 176 (0xb0), region = 32  ;;  %463 = vset.pattern.permute.xlu1 (!%p186_p3), %v495_v1  ;;  %461 = vset.pattern.permute.xlu0 (!%p186_p3), %v496_v2  ;;  %v293_v3 = vld [vmem:[%s582_s2 + $0x8] sm:$0x1] (!%p186_p3)  ;;  %v292_v6 = vld [vmem:[%s582_s2] sm:$0xff] (!%p186_p3)  ;;  %p221_p4 = scmp.lt.s32.totalorder (!%p186_p3), %s485_s15, 1 }
   0x8   : > { %281 = vperm.xlu1 (!%p186_p3), %463, %v243_v0   ;;  %251 = vperm.xlu0 (!%p186_p3), %461, %v243_v0   ;;  %v255_v8 = vshrl.u32 (!%p186_p3), %v254_v7, 7 }
   0xa   : > { %v256_v9 = vsub.s32 (!%p186_p3), 0, %v255_v8  ;;  %v286_v10 = vsub.s32 (!%p186_p3), 2, %v255_v8  ;;  %v270_v11 = vsub.s32 (!%p186_p3), 1, %v255_v8 }
   0xc   : > { %464 = vset.pattern.permute.xlu1 (!%p186_p3), %v496_v2  ;;  %462 = vset.pattern.permute.xlu0 (!%p186_p3), %v497_v4 }
   0xd   : > { %301 = vperm.xlu1 (!%p186_p3), %464, %v293_v3   ;;  %265 = vperm.xlu0 (!%p186_p3), %462, %v243_v0  }
   0xe   : > { %s590_s15 = smov (!%p221_p4, %s485_s15), 1 }
   0xf   : > { %s429_s27 = sshll.u32 %s590_s15, 2  ;;  %s430_s5 = sshll.u32 %s590_s15, 3 }
  0x10   : > { %s227_s30 = scalar_lea.vmem %s580_s0, %s429_s27  ;;  %s234_s8 = scalar_lea.vmem %s583_s3, %s430_s5 }
  0x11   : > { %261 = vperm.xlu0 %462, %v242_v5   ;;  %246 = vperm.xlu1 %464, %v242_v5   ;;  %v241_v12 = vld [vmem:[%s227_s30] sm:$0x7]  ;;  %s240_s11 = scalar_lea.vmem %s584_s4, %s590_s15 }
  0x12   : > { %v257_v15 = vrot.slane %v241_v12, %v256_v9  ;;  %v287_v16 = vrot.slane %v241_v12, %v286_v10  ;;  %v271_v17 = vrot.slane %v241_v12, %v270_v11 }
  0x15   : > { %465 = vset.pattern.permute.xlu1 %v495_v1  ;;  %466 = vset.pattern.permute.xlu0 %v496_v2 }
  0x16   : > { %277 = vperm.xlu1 %465, %v242_v5   ;;  %296 = vperm.xlu0 %466, %v292_v6  }
  0x87   : > { %v252_v13 = vpop.permute.xlu0 %251  ;;  %v282_v14 = vpop.permute.xlu1 %281 }
  0x88   : > { %v259_v20 = vmul.f32 %v257_v15, %v252_v13  ;;  %v289_v21 = vmul.f32 %v287_v16, %v282_v14 }
  0x8c   : > { %v302_v18 = vpop.permute.xlu1 %301  ;;  %v266_v19 = vpop.permute.xlu0 %265 }
  0x8d   : > { %v273_v22 = vmul.f32 %v271_v17, %v266_v19 }
  0x8f   : > { %v275_v23 = vadd.f32 %v273_v22, %v259_v20 }
  0x90   : > { %v262_v24 = vpop.permute.xlu0 %261  ;;  %v247_v25 = vpop.permute.xlu1 %246 }
  0x91   : > { %v291_v26 = vadd.f32 %v289_v21, %v275_v23  ;;  %v272_v27 = vmul.f32 %v271_v17, %v262_v24  ;;  %v258_v28 = vmul.f32 %v257_v15, %v247_v25 }
  0x93   : > { %v305_v29 = vadd.f32 %v302_v18, %v291_v26  ;;  %v274_v32 = vadd.f32 %v272_v27, %v258_v28 }
  0x95   : > { %v431_v30 = vmul.f32 -1.442695, %v305_v29  ;;  %v278_v31 = vpop.permute.xlu1 %277  ;;  %v297_v34 = vpop.permute.xlu0 %296 }
  0x96   : > { %v288_v33 = vmul.f32 %v287_v16, %v278_v31 }
  0x97   : > { %467 = vpow2.f32 %v431_v30 }
  0x98   : > { %v290_v35 = vadd.f32 %v288_v33, %v274_v32 }
  0x9a   : > { %v304_v36 = vadd.f32 %v297_v34, %v290_v35 }
  0x9c   : > { %v306_v37 = vmax.f32 %v304_v36, 0.0 }
  0x9e   : > { %307 = vst [vmem:[%s234_s8] sm:$0xff] %v306_v37 }
  0xa1   : > { %v468_v38 = vpop.eup %467 }
  0xa2   : > { %v311_v39 = vadd.f32 1.0, %v468_v38 }
  0xa4   : > { %469 = vrcp.f32 %v311_v39 }
  0xae   : > { %v470_v40 = vpop.eup %469 }
  0xaf   : > { %314 = vst [vmem:[%s240_s11] sm:$0x1] %v470_v40 }
  0xb0 PF: > { %s15_s17 = sadd.s32 1, %s493_s17   ;;  %s585_s15 = smov %s489_s16 }
  0xb1   : > { %p12_p5 = scmp.ge.s32.totalorder %s15_s17, 4   ;;  %s586_s16 = smov %s588_s18 }
  0xb3   :  { %14 = sbr.rel (!%p12_p5) target bundleno = 2 (0x2), region = 74 }

// kernel: forward.8
= control target key start
LH: loop header
LB: loop body
LE: loop exit
PB: predicated region body
PF: predicated region fallthrough
CT: control target
= control target key end

     0   :  { %10 = vsyncpa [#allocation3], 0  ;;  %s751_s0 = inlined_call_operand.vmem [shape: f32[2,3,128], index: 0, kind: input, shape index: {}]   ;;  %s752_s1 = inlined_call_operand.vmem [shape: f32[9,3], index: 1, kind: input, shape index: {}]   ;;  %s753_s2 = inlined_call_operand.vmem [shape: f32[9,1], index: 2, kind: input, shape index: {}]   ;;  %s754_s3 = inlined_call_operand.vmem [shape: f32[2,8,128], index: 3, kind: output, shape index: {0}]   ;;  %s755_s4 = inlined_call_operand.hbm [shape: f32[2,1,128], index: 4, kind: output, shape index: {1}]  }
   0x1   :  { %12 = vsyncpa [#allocation3 + $0x1], 0  ;;  %s620_s15 = smov 0   ;;  %s622_s16 = smov 0  }
   0x2   :  { %s624_s17 = smov 0   ;;  %s626_s18 = smov 0  }
   0x3   :  { %s628_s19 = smov 0   ;;  %s630_s20 = smov 0  }
   0x4 LB: > { %s432_s21 = sadd.s32 4294967295, %s589_s20   ;;  %s433_s22 = sadd.s32 4294967294, %s589_s20   ;;  %s589_s20 = sphi %s630_s20, %s18_s20   ;;  %s585_s19 = sphi %s628_s19, %s762_s19   ;;  %s581_s18 = sphi %s626_s18, %s761_s18   ;;  %s577_s17 = sphi %s624_s17, %s760_s17   ;;  %s573_s16 = sphi %s622_s16, %s759_s16   ;;  %s569_s15 = sphi %s620_s15, %s758_s15  }
   0x5   : > { %s30_s23 = sadd.s32 1, %s585_s19  ;;  %s137_s24 = sadd.s32 1, %s577_s17 }
   0x6   : > { %p32_p0 = scmp.ge.s32.totalorder %s30_s23, 2  ;;  %p147_p1 = scmp.ne.s32.totalorder %s577_s17, %s573_s16 }
   0x7   : > { %p148_p2 = scmp.eq.s32.totalorder %s432_s21, 1  ;;  %p153_p3 = scmp.ne.s32.totalorder %s573_s16, %s569_s15 }
   0x8   : > { %s764_s23 = smov (%p32_p0, %s30_s23), 0  ;;  %p154_p5 = scmp.eq.s32.totalorder %s433_s22, 1 }
   0x9   : > { %p660_p4 = por %p148_p2, %p147_p1  ;;  %s132_s26 = ssub.s32 %s585_s19, %s764_s23 }
   0xa   : > { %p436_p6 = scmp.ge.s32.totalorder %s589_s20, 1  ;;  %p135_p7 = scmp.eq.s32.totalorder %s132_s26, 0 }
   0xb   : > { %p667_p8 = por %p154_p5, %p153_p3  ;;  %p188_p9 = scmp.lt.s32.totalorder %s589_s20, 3 }
   0xc   : > { %s673_s28 = scalar_select %p135_p7, %s577_s17, %s137_s24  }
   0xd   : > { %p189_p10 = pnand %p436_p6, %p188_p9 }
   0xe   : > { %v238_v0 = vld [vmem:[%s752_s1 + $0x8] sm:$0x1] (!%p189_p10)  ;;  %v591_v1 = vmov (!%p189_p10), 2   ;;  %v592_v2 = vmov (!%p189_p10), 0   ;;  %v593_v4 = vmov (!%p189_p10), 1   ;;  %v237_v5 = vld [vmem:[%s752_s1] sm:$0xff] (!%p189_p10)  ;;  %v249_v7 = vlaneseq (!%p189_p10) }
   0xf   : > { %192 = sbr.rel (%p189_p10) target bundleno = 197 (0xc5), region = 32  ;;  %503 = vset.pattern.permute.xlu1 (!%p189_p10), %v591_v1  ;;  %501 = vset.pattern.permute.xlu0 (!%p189_p10), %v592_v2  ;;  %v288_v3 = vld [vmem:[%s753_s2 + $0x8] sm:$0x1] (!%p189_p10)  ;;  %v287_v6 = vld [vmem:[%s753_s2] sm:$0xff] (!%p189_p10)  ;;  %p222_p11 = scmp.lt.s32.totalorder (!%p189_p10), %s581_s18, 1 }
  0x10   : > { %276 = vperm.xlu1 (!%p189_p10), %503, %v238_v0   ;;  %246 = vperm.xlu0 (!%p189_p10), %501, %v238_v0   ;;  %v250_v8 = vshrl.u32 (!%p189_p10), %v249_v7, 7  ;;  %s220_s30 = sand.u32 (!%p189_p10), 1, %s573_s16   ;;  %s440_s5 = sshll.u32 (!%p189_p10), %s581_s18, 4 }
  0x11   : > { %s221_s6 = scalar_lea.vmem (!%p189_p10), [#allocation2], %s220_s30  ;;  %s704_s10 = scalar_lea.hbm (!%p189_p10), %s755_s4, %s440_s5 }
  0x12   : > { %v251_v9 = vsub.s32 (!%p189_p10), 0, %v250_v8  ;;  %v281_v10 = vsub.s32 (!%p189_p10), 2, %v250_v8  ;;  %v265_v11 = vsub.s32 (!%p189_p10), 1, %v250_v8  ;;  %s334_s7 = sshll.u32 (!%p189_p10), %s221_s6, 4  ;;  %s706_s7 = int_to_ptr.vmem [resolvable:$true] %s334_s7 }
  0x14   : > { %504 = vset.pattern.permute.xlu1 (!%p189_p10), %v592_v2  ;;  %502 = vset.pattern.permute.xlu0 (!%p189_p10), %v593_v4 }
  0x15   : > { %296 = vperm.xlu1 (!%p189_p10), %504, %v288_v3   ;;  %260 = vperm.xlu0 (!%p189_p10), %502, %v238_v0  }
  0x16   : > { %s689_s11 = scalar_select %p222_p11, %s581_s18, 1 }
  0x17   : > { %s594_s18 = smov [#allocation2]  }
  0x18   : > { %s437_s12 = sshll.u32 %s689_s11, 2  ;;  %s438_s22 = sshll.u32 %s689_s11, 3 }
  0x19   : > { %256 = vperm.xlu0 %502, %v237_v5   ;;  %241 = vperm.xlu1 %504, %v237_v5   ;;  %s228_s21 = scalar_lea.vmem %s751_s0, %s437_s12  ;;  %s235_s29 = scalar_lea.vmem %s754_s3, %s438_s22 }
  0x1a   : > { %v236_v12 = vld [vmem:[%s228_s21] sm:$0x7]  ;;  %s318_s11 = scalar_lea.sflag [#allocation3], %s220_s30  ;;  %s511_s12 = scalar_lea.vmem %s706_s7, 16 }
  0x1b   : > { %v252_v15 = vrot.slane %v236_v12, %v251_v9  ;;  %v282_v16 = vrot.slane %v236_v12, %v281_v10  ;;  %v266_v17 = vrot.slane %v236_v12, %v265_v11  ;;  %p512_p12 = scmp.ne.s32.totalorder %s706_s7, %s511_s12  ;;  %s515_s13 = sshll.u32 %s594_s18, 4  ;;  %s516_s13 = int_to_ptr.vmem [resolvable:$false] %s515_s13 }
  0x1c   : > { %s517_s14 = scalar_lea.vmem %s516_s13, 32  ;;  %p518_p1 = scmp.lt.s32.totalorder %s706_s7, %s516_s13 }
  0x1d   : > { %505 = vset.pattern.permute.xlu1 %v591_v1  ;;  %506 = vset.pattern.permute.xlu0 %v592_v2  ;;  %p513_p13 = pnand %p512_p12, %p660_p4  ;;  %p519_p2 = scmp.lt.s32.totalorder %s517_s14, %s511_s12 }
  0x1e   : > { %272 = vperm.xlu1 %505, %v237_v5   ;;  %291 = vperm.xlu0 %506, %v287_v6  }
  0x1f   : > { %p514_p0 = pneg %p513_p13  ;;  %p520_p3 = por %p519_p2, %p518_p1 }
  0x21   : > { %p521_p5 = pnand %p520_p3, %p514_p0 }
  0x8f   : > { %v247_v13 = vpop.permute.xlu0 %246  ;;  %v277_v14 = vpop.permute.xlu1 %276 }
  0x90   : > { %v254_v20 = vmul.f32 %v252_v15, %v247_v13  ;;  %v284_v21 = vmul.f32 %v282_v16, %v277_v14 }
  0x94   : > { %v297_v18 = vpop.permute.xlu1 %296  ;;  %v261_v19 = vpop.permute.xlu0 %260 }
  0x95   : > { %v268_v22 = vmul.f32 %v266_v17, %v261_v19 }
  0x97   : > { %v270_v23 = vadd.f32 %v268_v22, %v254_v20 }
  0x98   : > { %v257_v24 = vpop.permute.xlu0 %256  ;;  %v242_v25 = vpop.permute.xlu1 %241 }
  0x99   : > { %v286_v26 = vadd.f32 %v284_v21, %v270_v23  ;;  %v267_v27 = vmul.f32 %v266_v17, %v257_v24  ;;  %v253_v28 = vmul.f32 %v252_v15, %v242_v25 }
  0x9b   : > { %v300_v29 = vadd.f32 %v297_v18, %v286_v26  ;;  %v269_v32 = vadd.f32 %v267_v27, %v253_v28 }
  0x9d   : > { %v439_v30 = vmul.f32 -1.442695, %v300_v29  ;;  %v273_v31 = vpop.permute.xlu1 %272  ;;  %v292_v34 = vpop.permute.xlu0 %291 }
  0x9e   : > { %v283_v33 = vmul.f32 %v282_v16, %v273_v31 }
  0x9f   : > { %507 = vpow2.f32 %v439_v30 }
  0xa0   : > { %v285_v35 = vadd.f32 %v283_v33, %v269_v32 }
  0xa2   : > { %v299_v36 = vadd.f32 %v292_v34, %v285_v35 }
  0xa4   : > { %v301_v37 = vmax.f32 %v299_v36, 0.0 }
  0xa6   : > { %302 = vst [vmem:[%s235_s29] sm:$0xff] %v301_v37 }
  0xa9   : > { %v508_v38 = vpop.eup %507 }
  0xaa   : > { %v306_v39 = vadd.f32 1.0, %v508_v38 }
  0xac   : > { %509 = vrcp.f32 %v306_v39 }
  0xb6   : > { %v510_v40 = vpop.eup %509 }
  0xb7   : > { %309 = vst [vmem:[%s221_s6] sm:$0x1] %v510_v40 }
  0xb8   : > { %524 = shalt.err (!%p521_p5)
}
  0xb9   : > { %s525_s21 = scalar_lea.hbm %s704_s10, 16  ;;  %s529_s26 = scalar_lea.hbm %s755_s4, 32 }
  0xba   : > { %p526_p6 = scmp.ne.s32.totalorder %s704_s10, %s525_s21  ;;  %p530_p10 = scmp.lt.u32.totalorder %s704_s10, %s755_s4 }
  0xbb   : > { %p531_p11 = scmp.lt.u32.totalorder %s529_s26, %s525_s21  ;;  %p533_p13 = scmp.lt.u32.totalorder %s525_s21, %s704_s10 }
  0xbc   : > { %p527_p7 = pnand %p526_p6, %p660_p4 }
  0xbd   : > { %p532_p12 = por %p531_p11, %p530_p10 }
  0xbe   : > { %p528_p9 = pneg %p527_p7 }
  0xbf   : > { %p534_p0 = por %p533_p13, %p532_p12 }
  0xc1   : > { %p535_p1 = pnand %p534_p0, %p528_p9 }
  0xc3   : > { %538 = shalt.err (!%p535_p1)
}
  0xc4   : > { %443 = dma.vmem_to_hbm [thread:$0]  (%p660_p4), %s706_s7, 16, %s704_s10, %s318_s11  }
  0xc5 PF: > { %p449_p2 = scmp.ge.s32.totalorder %s589_s20, 2  ;;  %s356_s5 = sand.u32 1, %s569_s15  }
  0xc6   : > { %s357_s6 = scalar_lea.sflag [#allocation3], %s356_s5 }
  0xc7   : > { %p446_p3 = pnand %p449_p2, %p667_p8 }
  0xc9   : > { %564 = dma.done.wait (!%p446_p3), %s357_s6, 16  }
  0xca   : > { %566 = vsyncadd (!%p446_p3), %s357_s6, 4294967280  ;;  %s18_s20 = sadd.s32 1, %s589_s20   ;;  %s758_s15 = smov %s573_s16 }
  0xcb   : > { %p15_p5 = scmp.ge.s32.totalorder %s18_s20, 4   ;;  %s759_s16 = smov %s577_s17 }
  0xcc   : > { %s760_s17 = smov %s673_s28  ;;  %s761_s18 = smov %s585_s19 }
  0xcd   : > { %s762_s19 = smov %s764_s23  ;;  %17 = sbr.rel (!%p15_p5) target bundleno = 4 (0x4), region = 79 }
  0xd4   :  { %361 = vsyncpa [#allocation3], 1 }
  0xd5   :  { %363 = vsyncpa [#allocation3 + $0x1], 1 }

// kernel: custom-call.97
= control target key start
LH: loop header
LB: loop body
LE: loop exit
PB: predicated region body
PF: predicated region fallthrough
CT: control target
= control target key end

     0   :  { %5 = vsyncpa [#allocation6], 0  ;;  %s896_s0 = inlined_call_operand.vmem [shape: f32[2,3,3], index: 0, kind: input, shape index: {}]   ;;  %s897_s1 = inlined_call_operand.vmem [shape: f32[2,3,3], index: 1, kind: output, shape index: {0}]   ;;  %s898_s2 = inlined_call_operand.hbm [shape: s32[2,3], index: 2, kind: output, shape index: {1}]   ;;  %s899_s3 = inlined_call_operand.vmem [shape: s32[2,3], index: 3, kind: output, shape index: {2}]  }
   0x1   :  { %7 = vsyncpa [#allocation6 + $0x1], 0  ;;  %s715_s12 = smov 0   ;;  %s717_s13 = smov 0  }
   0x2   :  { %s719_s14 = smov 0   ;;  %s721_s15 = smov 0  }
   0x3 LB: > { %s736_s16 = sadd.s32 4294967295, %s687_s15   ;;  %s550_s17 = sadd.s32 4294967294, %s687_s15   ;;  %s687_s15 = sphi %s721_s15, %s907_s15   ;;  %s683_s14 = sphi %s719_s14, %s906_s14   ;;  %s679_s13 = sphi %s717_s13, %s905_s13   ;;  %s675_s12 = sphi %s715_s12, %s904_s12  }
   0x4   : > { %s740_s18 = sadd.s32 1, %s687_s15   ;;  %s17_s19 = sshrl.u32 %s687_s15, 3 }
   0x5   : > { %s18_s20 = sshrl.u32 %s740_s18, 3  ;;  %s22_s21 = sadd.s32 1, %s683_s14 }
   0x6   : > { %s19_s22 = ssub.s32 %s17_s19, %s18_s20  ;;  %p32_p0 = scmp.ne.s32.totalorder %s683_s14, %s679_s13 }
   0x7   : > { %p20_p1 = scmp.eq.s32.totalorder %s19_s22, 0  ;;  %p33_p2 = scmp.eq.s32.totalorder %s736_s16, 1 }
   0x8   : > { %p38_p3 = scmp.ne.s32.totalorder %s679_s13, %s675_s12  ;;  %p39_p4 = scmp.eq.s32.totalorder %s550_s17, 1 }
   0x9   : > { %s751_s23 = scalar_select %p20_p1, %s683_s14, %s22_s21  }
   0xa   : > { %p753_p5 = por %p33_p2, %p32_p0  ;;  %p757_p6 = por %p39_p4, %p38_p3 }
   0xb   : > { %p552_p7 = scmp.ge.s32.totalorder %s687_s15, 2 }
   0xc   : > { %s85_s26 = sand.u32 (!%p552_p7), 1, %s687_s15   ;;  %s554_s27 = sshll.u32 (!%p552_p7), %s687_s15, 2 }
   0xd   : > { %83 = sbr.rel (%p552_p7) target bundleno = 20 (0x14), region = 16  ;;  %s553_s28 = sshll.u32 (!%p552_p7), %s85_s26, 2 }
   0xe   : > { %s89_s4 = scalar_lea.vmem (!%p552_p7), %s896_s0, %s554_s27  ;;  %s87_s5 = scalar_lea.vmem (!%p552_p7), [#allocation1], %s553_s28 }
   0xf   : > { %v105_v0 = vld [vmem:[%s89_s4] sm:$0xf] (!%p552_p7) }
  0x10   : > { %106 = vst [vmem:[%s87_s5] sm:$0xf] (!%p552_p7), %v105_v0 }
  0x14 PF: > { %p555_p8 = scmp.ge.s32.totalorder %s687_s15, 1  ;;  %p122_p9 = scmp.lt.s32.totalorder %s687_s15, 3 }
  0x16   : > { %p123_p10 = pnand %p555_p8, %p122_p9 }
  0x18   : > { %126 = sbr.rel (%p123_p10) target bundleno = 451 (0x1c3), region = 50 }
  0x1f   : > { %s133_s6 = sand.u32 1, %s736_s16   ;;  %s144_s7 = sand.u32 1, %s679_s13   ;;  %v166_v1 = vlaneseq  ;;  %v693_v4 = vmov 0  }
  0x20   : > { %s773_s8 = sshll.u32 %s133_s6, 2  ;;  %s777_s9 = sshll.u32 %s144_s7, 1 }
  0x21   : > { %v780_v2 = vshrl.u32 %v166_v1, 7  ;;  %s135_s10 = scalar_lea.vmem [#allocation1], %s773_s8  ;;  %s161_s11 = sand.u32 7, %s736_s16  }
  0x22   : > { %v155_v3 = vld [vmem:[%s135_s10] sm:$0xf]  ;;  %s785_s17 = scalar_lea.vmem [#allocation4], %s161_s11  ;;  %s139_s19 = scalar_lea.vmem [#allocation3], %s773_s8 }
  0x23   : > { %156 = vst [vmem:[#allocation0] sm:$0xf] %v155_v3  ;;  %170 = vst [vmem:[#allocation9] sm:$0xff] %v780_v2  ;;  %s146_s20 = scalar_lea.vmem [#allocation5], %s777_s9  ;;  %s152_s21 = scalar_lea.vmem [#allocation8], %s777_s9 }
  0x24   : > { %165 = vst [vmem:[%s785_s17] sm:$0x1] %v693_v4  ;;  %s791_s22 = scalar_lea.vmem [#allocation7], %s161_s11  ;;  %s793_s26 = smov 0  }
  0x2a   : > { %v159_v5 = vld [vmem:[#allocation0] sm:$0xff] }
  0x2b   : > { %160 = vst [vmem:[#allocation2] sm:$0xff] %v159_v5 }
  0x2c LB: >> { %vm186_vm0 = vcmp.lt.s32.totalorder %v780_v2, 3  ;;  %v800_v8 = vstv %s691_s26  ;;  %s227_s27 = ssub.s32 128, %s691_s26  ;;  %v233_v38 = vand.u32 127, %v166_v1  ;;  %v236_v40 = vld [vmem:[%s785_s17] ss:$0 sm:$0xff]  ;;  %s239_s28 = scalar_lea.vmem [#allocation2], %s691_s26  ;;  %s691_s26 = sphi %s793_s26, %s176_s26  }
  0x2d   : >> { %vm185_vm1 = vcmp.ge.s32.totalorder %v780_v2, %v800_v8  ;;  %s245_s30 = scalar_lea.vmem [#allocation9], %s691_s26  ;;  %vm265_vm15 = vcmp.gt.s32.totalorder %v780_v2, %v800_v8  ;;  %s176_s26 = sadd.s32 1, %s691_s26  }
  0x2e   : >> { %vm187_vm3 = vmand %vm185_vm1, %vm186_vm0  ;;  %vm257_vm12 = vcmp.gt.s32.totalorder %v233_v38, %v800_v8  ;;  %vm234_vm13 = vcmp.eq.s32.totalorder %v233_v38, %v800_v8  ;;  %v247_v42 = vld [vmem:[%s245_s30] ss:$0 sm:$0xff]  ;;  %p173_p11 = scmp.ge.s32.totalorder %s176_s26, 3  }
  0x2f   : >> { %vm269_vm1 = vmand %vm265_vm15, %vm234_vm13  ;;  %s900_s6 = sshrl.u32 (%p173_p11), %s736_s16, 3  ;;  %s564_s10 = sshll.u32 (%p173_p11), %s736_s16, 2 }
  0x30   : > { %s565_s11 = sshll.u32 (%p173_p11), %s900_s6, 5 }
  0x32   : >> { %v181_v6 = vld [vmem:[#allocation2] sm:$0xff]  ;;  %v241_v41 = vld [vmem:[%s239_s28] ss:$0 sm:$0xff] }
  0x33   : >> { %v182_v7 = vand.u32 2147483647, %v181_v6 }
  0x35   : >> { %vm560_vm2 = vcmp.gt.f32.partialorder %v182_v7, -inf }
  0x36   : >> { %vm189_vm4 = vmand %vm187_vm3, %vm560_vm2 }
  0x37   : >> { %v190_v9 = vsel %vm189_vm4, %v780_v2, %v800_v8  ;;  %v191_v10 = vsel %vm189_vm4, %v182_v7, -inf }
  0x38   : >> { %v192_v11 = vrot.slane %v191_v10, 1  ;;  %v193_v12 = vrot.slane %v190_v9, 1 }
  0x3a   : >> { %vm194_vm5 = vcmp.ge.f32.partialorder %v192_v11, %v191_v10  ;;  %v197_v13 = vrot.slane %v192_v11, 1  ;;  %v198_v14 = vrot.slane %v193_v12, 1 }
  0x3b   : >> { %v195_v15 = vsel %vm194_vm5, %v192_v11, %v191_v10  ;;  %v196_v16 = vsel %vm194_vm5, %v193_v12, %v190_v9 }
  0x3c   : >> { %vm199_vm6 = vcmp.ge.f32.partialorder %v197_v13, %v195_v15  ;;  %v202_v17 = vrot.slane %v197_v13, 1  ;;  %v203_v18 = vrot.slane %v198_v14, 1 }
  0x3d   : >> { %v200_v19 = vsel %vm199_vm6, %v197_v13, %v195_v15  ;;  %v201_v20 = vsel %vm199_vm6, %v198_v14, %v196_v16 }
  0x3e   : >> { %vm204_vm7 = vcmp.ge.f32.partialorder %v202_v17, %v200_v19  ;;  %v207_v21 = vrot.slane %v202_v17, 1  ;;  %v208_v22 = vrot.slane %v203_v18, 1 }
  0x3f   : >> { %v205_v23 = vsel %vm204_vm7, %v202_v17, %v200_v19  ;;  %v206_v24 = vsel %vm204_vm7, %v203_v18, %v201_v20 }
  0x40   : >> { %vm209_vm8 = vcmp.ge.f32.partialorder %v207_v21, %v205_v23  ;;  %v212_v25 = vrot.slane %v207_v21, 1  ;;  %v213_v26 = vrot.slane %v208_v22, 1 }
  0x41   : >> { %v210_v27 = vsel %vm209_vm8, %v207_v21, %v205_v23  ;;  %v211_v28 = vsel %vm209_vm8, %v208_v22, %v206_v24 }
  0x42   : >> { %vm214_vm9 = vcmp.ge.f32.partialorder %v212_v25, %v210_v27  ;;  %v217_v29 = vrot.slane %v212_v25, 1  ;;  %v218_v30 = vrot.slane %v213_v26, 1 }
  0x43   : >> { %v215_v31 = vsel %vm214_vm9, %v212_v25, %v210_v27  ;;  %v216_v32 = vsel %vm214_vm9, %v213_v26, %v211_v28 }
  0x44   : >> { %vm219_vm10 = vcmp.ge.f32.partialorder %v217_v29, %v215_v31  ;;  %v222_v33 = vrot.slane %v217_v29, 1  ;;  %v223_v34 = vrot.slane %v218_v30, 1 }
  0x45   : >> { %v220_v35 = vsel %vm219_vm10, %v217_v29, %v215_v31  ;;  %v221_v36 = vsel %vm219_vm10, %v218_v30, %v216_v32 }
  0x46   : >> { %vm224_vm11 = vcmp.ge.f32.partialorder %v222_v33, %v220_v35 }
  0x47   : >> { %v226_v37 = vsel %vm224_vm11, %v223_v34, %v221_v36 }
  0x48   : >> { %228 = vrot.lane.b32.xlu0 %v226_v37, %s227_s27  ;;  %s357_s27 = scalar_lea.vmem (%p173_p11), %s897_s1, %s564_s10 }
  0xba   : >> { %v229_v39 = vpop.permute.xlu0 %228 }
  0xbb   : >> { %569 = vpush %v229_v39 }
  0xec   : >> { %s570_s29 = spop %569 }
  0xed   : >> { %v235_v43 = vstv %s570_s29  ;;  %s240_s4 = scalar_lea.vmem [#allocation2], %s570_s29  ;;  %s246_s5 = scalar_lea.vmem [#allocation9], %s570_s29 }
  0xee   : >> { %v242_v44 = vld [vmem:[%s240_s4] ss:$0 sm:$0xff]  ;;  %v237_v46 = vsel %vm234_vm13, %v235_v43, %v236_v40 }
  0xef   : >> { %v248_v45 = vld [vmem:[%s246_s5] ss:$0 sm:$0xff]  ;;  %243 = vst [vmem:[%s240_s4] sm:$0x1] %v241_v41  ;;  %vm251_vm14 = vcmp.ne.f32.partialorder %v242_v44, 0.0  ;;  %238 = vst [vmem:[%s785_s17] sm:$0x1] %v237_v46  ;;  %v258_v53 = vsel %vm257_vm12, %v242_v44, 0.0 }
  0xf0   : >> { %249 = vst [vmem:[%s246_s5] sm:$0x1] %v247_v42  ;;  %244 = vst [vmem:[%s239_s28] sm:$0x1] %v242_v44  ;;  %s399_s4 = sshll.u32 (%p173_p11), %s146_s20, 4  ;;  %s348_s5 = scalar_lea.sflag (%p173_p11), [#allocation6], %s144_s7  ;;  %s400_s4 = int_to_ptr.vmem [resolvable:$true] %s399_s4 }
  0xf1   : >> { %250 = vst [vmem:[%s245_s30] sm:$0x1] %v248_v45  ;;  %vm252_vm0 = vmand %vm234_vm13, %vm251_vm14  ;;  %s843_s30 = scalar_lea.hbm (%p173_p11), %s898_s2, %s565_s11  ;;  %s621_s6 = scalar_lea.vmem (%p173_p11), %s400_s4, 32 }
  0xf2   : >> { %v253_v47 = vsel %vm252_vm0, %v242_v44, 1.0  ;;  %p622_p12 = scmp.ne.s32.totalorder (%p173_p11), %s400_s4, %s621_s6  ;;  %s694_s17 = smov (%p173_p11), [#allocation5]  }
  0xf3   : >> { %v266_v48 = vsel %vm265_vm15, %v253_v47, 1.0  ;;  %s625_s10 = sshll.u32 (%p173_p11), %s694_s17, 4  ;;  %s626_s10 = int_to_ptr.vmem [resolvable:$false] %s625_s10 }
  0xf4   : >> { %619 = vrcp.f32 %v266_v48  ;;  %p623_p13 = pnand (%p173_p11), %p622_p12, %p753_p5  ;;  %s627_s8 = scalar_lea.vmem (%p173_p11), %s626_s10, 64 }
  0xf5   : > { %p628_p1 = scmp.lt.s32.totalorder (%p173_p11), %s400_s4, %s626_s10  ;;  %p629_p2 = scmp.lt.s32.totalorder (%p173_p11), %s627_s8, %s621_s6 }
  0xf6   : > { %v334_v59 = vld [vmem:[#allocation4] sm:$0x3] (%p173_p11)  ;;  %p624_p0 = pneg (%p173_p11), %p623_p13 }
  0xf7   : >> { %v262_v50 = vld [vmem:[#allocation2] sm:$0xff]  ;;  %336 = vst [vmem:[%s146_s20] sm:$0x3] (%p173_p11), %v334_v59  ;;  %p630_p3 = por (%p173_p11), %p629_p2, %p628_p1 }
  0xf8   : > { %v276_v57 = vld [vmem:[#allocation9] sm:$0xff] (%p173_p11) }
  0xf9   : > { %p631_p4 = pnand (%p173_p11), %p630_p3, %p624_p0 }
  0xfe   : >> { %v620_v49 = vpop.eup %619 }
  0xff   : >> { %v268_v51 = vmul.f32 %v620_v49, %v262_v50 }
 0x101   : >> { %v270_v52 = vsel %vm269_vm1, %v268_v51, 0.0 }
 0x102   : >> { %271 = vadd.xlane.f32.xlu0 %v270_v52 }
 0x12f   : > { %292 = vxpose.xlu0.b32.start.end [1/1] (short) (narrow) (%p173_p11), %v276_v57, 8 }
 0x18e   : > { %175 = sbr.rel (!%p173_p11) target bundleno = 44 (0x2c), region = 202 }
 0x18f   : >> { %v272_v54 = vpop.xlane.xlu0 %271 }
 0x190   : >> { %v273_v55 = vmul.f32 %v272_v54, %v258_v53 }
 0x192   : >> { %v274_v56 = vsub.f32 %v268_v51, %v273_v55 }
 0x194   : >> { %275 = vst [vmem:[#allocation2] sm:$0xff] %v274_v56 }
 0x19b   : > { %v328_v58 = vld [vmem:[#allocation2] sm:$0xf] }
 0x19c   : > { %330 = vst [vmem:[%s139_s19] sm:$0xf] %v328_v58 }
 0x1a3   : > { %v373_v60 = vld [vmem:[%s139_s19] sm:$0xf] }
 0x1a4   : > { %374 = vst [vmem:[%s357_s27] sm:$0xf] %v373_v60 }
 0x1a5   : > { %634 = shalt.err (!%p631_p4)
}
 0x1a6   : > { %s635_s7 = scalar_lea.hbm %s843_s30, 32  ;;  %s639_s11 = scalar_lea.hbm %s898_s2, 32 }
 0x1a7   : > { %p636_p8 = scmp.ne.s32.totalorder %s843_s30, %s635_s7  ;;  %p640_p11 = scmp.lt.u32.totalorder %s843_s30, %s898_s2 }
 0x1a8   : > { %p641_p12 = scmp.lt.u32.totalorder %s639_s11, %s635_s7  ;;  %p643_p0 = scmp.lt.u32.totalorder %s635_s7, %s843_s30 }
 0x1a9   : > { %p637_p9 = pnand %p636_p8, %p753_p5 }
 0x1aa   : > { %p642_p13 = por %p641_p12, %p640_p11 }
 0x1ab   : > { %p638_p10 = pneg %p637_p9 }
 0x1ac   : > { %p644_p1 = por %p643_p0, %p642_p13 }
 0x1ae   : > { %p645_p2 = pnand %p644_p1, %p638_p10 }
 0x1b0   : > { %648 = shalt.err (!%p645_p2)
}
 0x1b1   : > { %571 = dma.vmem_to_hbm [thread:$0]  (%p753_p5), %s400_s4, 32, %s843_s30, %s348_s5   ;;  %v308_v61 = vpop.trf.xlu0 }
 0x1b2   : > { %324 = vst [vmem:[%s791_s22] sm:$0x1] %v308_v61  ;;  %s903_s6 = sshrl.u32 (%p753_p5), %s736_s16, 3 }
 0x1b3   : > { %s566_s28 = sshll.u32 (%p753_p5), %s903_s6, 1 }
 0x1b4   : > { %405 = sbr.rel (!%p753_p5) target bundleno = 451 (0x1c3), region = 96  ;;  %s408_s10 = scalar_lea.vmem (%p753_p5), %s899_s3, %s566_s28 }
 0x1b9   : > { %v340_v62 = vld [vmem:[#allocation7] sm:$0x3] }
 0x1ba   : > { %342 = vst [vmem:[%s152_s21] sm:$0x3] %v340_v62 }
 0x1c1   : > { %v424_v63 = vld [vmem:[%s152_s21] sm:$0x3] }
 0x1c2   : > { %425 = vst [vmem:[%s408_s10] sm:$0x3] %v424_v63 }
 0x1c3 PF: > { %s452_s22 = sand.u32 1, %s675_s12   ;;  %p574_p5 = pnand %p552_p7, %p757_p6 }
 0x1c4   : > { %s453_s24 = scalar_lea.sflag [#allocation6], %s452_s22 }
 0x1c5   : > { %670 = dma.done.wait (!%p574_p5), %s453_s24, 32  }
 0x1c6   : > { %672 = vsyncadd (!%p574_p5), %s453_s24, 4294967264  ;;  %p10_p3 = scmp.ge.s32.totalorder %s740_s18, 4   ;;  %s904_s12 = smov %s679_s13 }
 0x1c7   : > { %s905_s13 = smov %s683_s14  ;;  %s906_s14 = smov %s751_s23 }
 0x1c8   : > { %s907_s15 = smov %s740_s18  ;;  %12 = sbr.rel (!%p10_p3) target bundleno = 3 (0x3), region = 213 }
 0x1cf   :  { %465 = vsyncpa [#allocation6], 1 }
 0x1d0   :  { %467 = vsyncpa [#allocation6 + $0x1], 1 }

// kernel: custom-call.98
= control target key start
LH: loop header
LB: loop body
LE: loop exit
PB: predicated region body
PF: predicated region fallthrough
CT: control target
= control target key end

     0   :  { %s342_s6 = smov 0   ;;  %s344_s7 = smov 0   ;;  %s389_s0 = inlined_call_operand.vmem [shape: f32[2,1,3,3], index: 0, kind: input, shape index: {}]   ;;  %s390_s1 = inlined_call_operand.vmem [shape: f32[2,1,3,3], index: 1, kind: output, shape index: {}]  }
   0x1   :  { %s346_s8 = smov 0  }
   0x2 LB: > { %s268_s9 = sadd.s32 4294967295, %s329_s8   ;;  %s33_s10 = sadd.s32 1, %s325_s7  ;;  %s329_s8 = sphi %s346_s8, %s7_s8   ;;  %s325_s7 = sphi %s344_s7, %s392_s7   ;;  %s321_s6 = sphi %s342_s6, %s391_s6  }
   0x3   : > { %p35_p0 = scmp.ge.s32.totalorder %s33_s10, 2  ;;  %p270_p1 = scmp.ge.s32.totalorder %s329_s8, 2 }
   0x4   : > { %s49_s11 = sand.u32 (!%p270_p1), 1, %s329_s8   ;;  %s272_s12 = sshll.u32 (!%p270_p1), %s325_s7, 2 }
   0x5   : > { %s394_s10 = smov (%p35_p0, %s33_s10), 0  ;;  %47 = sbr.rel (%p270_p1) target bundleno = 12 (0xc), region = 16 }
   0x6   : > { %s271_s13 = sshll.u32 (!%p270_p1), %s49_s11, 2  ;;  %s56_s16 = scalar_lea.vmem (!%p270_p1), %s389_s0, %s272_s12 }
   0x7   : > { %v72_v0 = vld [vmem:[%s56_s16] sm:$0xf] (!%p270_p1)  ;;  %s51_s17 = scalar_lea.vmem (!%p270_p1), [#allocation1], %s271_s13 }
   0x8   : > { %73 = vst [vmem:[%s51_s17] sm:$0xf] (!%p270_p1), %v72_v0 }
   0xc PF: > { %p273_p2 = scmp.ge.s32.totalorder %s329_s8, 1  ;;  %p89_p3 = scmp.lt.s32.totalorder %s329_s8, 3 }
   0xe   : > { %p90_p4 = pnand %p273_p2, %p89_p3 }
  0x10   : > { %93 = sbr.rel (%p90_p4) target bundleno = 511 (0x1ff), region = 50 }
  0x17   : > { %s369_s18 = sand.u32 1, %s268_s9   ;;  %v111_v1 = vlaneseq  ;;  %v331_v11 = vmov -1.0   ;;  %s277_s22 = sshll.u32 %s321_s6, 2 }
  0x18   : > { %s274_s19 = sshll.u32 %s369_s18, 2  ;;  %s177_s25 = scalar_lea.vmem %s390_s1, %s277_s22 }
  0x19   : > { %s102_s20 = scalar_lea.vmem [#allocation1], %s274_s19  ;;  %v112_v3 = vand.u32 127, %v111_v1  ;;  %v115_v4 = vshrl.u32 %v111_v1, 7  ;;  %s106_s21 = scalar_lea.vmem [#allocation3], %s274_s19 }
  0x1a   : > { %v109_v2 = vld [vmem:[%s102_s20] sm:$0xf] }
  0x1b   : > { %110 = vst [vmem:[#allocation0] sm:$0xf] %v109_v2  ;;  %vm113_vm0 = vcmp.lt.s32.totalorder %v112_v3, 3  ;;  %vm122_vm1 = vcmp.le.s32.totalorder %v115_v4, %v112_v3  ;;  %vm117_vm2 = vcmp.eq.s32.totalorder %v115_v4, %v112_v3  ;;  %vm136_vm4 = vcmp.eq.s32.totalorder %v112_v3, 2 }
  0x1c   : > { %vm123_vm3 = vmand %vm122_vm1, %vm113_vm0  ;;  %vm133_vm5 = vcmp.eq.s32.totalorder %v112_v3, %v115_v4  ;;  %v137_v12 = vsel %vm136_vm4, 1.0, %v331_v11  ;;  %vm144_vm6 = vcmp.eq.s32.totalorder %v112_v3, 1  ;;  %vm153_vm7 = vcmp.eq.s32.totalorder %v112_v3, 0 }
  0x1d   : > { %v138_v13 = vsel %vm133_vm5, %v137_v12, 0.0 }
  0x22   : > { %v118_v5 = vld [vmem:[#allocation0] sm:$0xff] }
  0x23   : > { %v119_v6 = vsel %vm117_vm2, %v118_v5, 0.0  ;;  %v124_v7 = vsel %vm123_vm3, %v118_v5, 0.0 }
  0x24   : > { %120 = vadd.xlane.f32.xlu0 %v119_v6 }
  0xb1   : > { %v121_v8 = vpop.xlane.xlu0 %120 }
  0xb2   : > { %305 = vrcp.f32 %v121_v8  ;;  %vm160_vm8 = vweird.f32 %v121_v8 }
  0xbc   : > { %v306_v9 = vpop.eup %305 }
  0xbd   : > { %v126_v10 = vmul.f32 %v306_v9, %v124_v7 }
  0xbf   : > { %127 = vst [vmem:[#allocation4] sm:$0xff] %v126_v10 }
  0xc6   : > { %v140_v14 = vld [vmem:[#allocation4 + $0x1] ss:$0 sm:$0xff]  ;;  %v149_v17 = vld [vmem:[#allocation4] ss:$0 sm:$0xff] }
  0xc7   : > { %v141_v15 = vxor.u32 2147483648, %v140_v14  ;;  %v150_v19 = vxor.u32 2147483648, %v149_v17 }
  0xc9   : > { %v145_v16 = vmul.f32 %v141_v15, %v138_v13 }
  0xcb   : > { %146 = vadd.xlane.f32.xlu0 %v145_v16 }
 0x158   : > { %v147_v18 = vpop.xlane.xlu0 %146 }
 0x159   : > { %v148_v20 = vsel %vm144_vm6, %v147_v18, %v138_v13 }
 0x15a   : > { %v154_v21 = vmul.f32 %v150_v19, %v148_v20 }
 0x15c   : > { %155 = vadd.xlane.f32.xlu1 %v154_v21 }
 0x1e9   : > { %v156_v22 = vpop.xlane.xlu1 %155 }
 0x1ea   : > { %v157_v23 = vsel %vm153_vm7, %v156_v22, %v148_v20 }
 0x1eb   : > { %v159_v24 = vmul.f32 %v306_v9, %v157_v23 }
 0x1ed   : > { %v161_v25 = vsel %vm160_vm8, %v157_v23, %v159_v24 }
 0x1ee   : > { %162 = vst [vmem:[#allocation2] sm:$0xff] %v161_v25 }
 0x1f5   : > { %v166_v26 = vld [vmem:[#allocation2] sm:$0xf] }
 0x1f6   : > { %168 = vst [vmem:[%s106_s21] sm:$0xf] %v166_v26 }
 0x1fd   : > { %v193_v27 = vld [vmem:[%s106_s21] sm:$0xf] }
 0x1fe   : > { %194 = vst [vmem:[%s177_s25] sm:$0xf] %v193_v27 }
 0x1ff PF: > { %s7_s8 = sadd.s32 1, %s329_s8   ;;  %s391_s6 = smov %s325_s7 }
 0x200   : > { %p4_p5 = scmp.ge.s32.totalorder %s7_s8, 4   ;;  %s392_s7 = smov %s394_s10 }
 0x202   :  { %6 = sbr.rel (!%p4_p5) target bundleno = 2 (0x2), region = 111 }

// kernel: forward.12
= control target key start
LH: loop header
LB: loop body
LE: loop exit
PB: predicated region body
PF: predicated region fallthrough
CT: control target
= control target key end

     0   :  { %s1466_s15 = smov 0   ;;  %s1468_s16 = smov 0   ;;  %s1653_s0 = inlined_call_operand.vmem [shape: bf16[3,2,8,128], index: 0, kind: input, shape index: {}]   ;;  %s1654_s1 = inlined_call_operand.vmem [shape: bf16[2,8,128], index: 1, kind: input, shape index: {}]   ;;  %s1655_s2 = inlined_call_operand.vmem [shape: bf16[2,8,128], index: 2, kind: input, shape index: {}]   ;;  %s1656_s3 = inlined_call_operand.vmem [shape: f32[2,1,128], index: 3, kind: input, shape index: {}]   ;;  %s1657_s4 = inlined_call_operand.vmem [shape: f32[2,1,3,4], index: 4, kind: output, shape index: {}]  }
   0x1   :  { %s1470_s17 = smov 0   ;;  %s1472_s18 = smov 0  }
   0x2   :  { %s1474_s19 = smov 0  }
   0x3 LB: > { %s33_s20 = sadd.s32 1, %s1433_s18  ;;  %p51_p1 = scmp.ne.s32.totalorder %s1425_s16, %s1421_s15  ;;  %s1437_s19 = sphi %s1474_s19, %s14_s19   ;;  %s1433_s18 = sphi %s1472_s18, %s1661_s18   ;;  %s1429_s17 = sphi %s1470_s17, %s1660_s17   ;;  %s1425_s16 = sphi %s1468_s16, %s1659_s16   ;;  %s1421_s15 = sphi %s1466_s15, %s1658_s15  }
   0x4   : > { %p35_p0 = scmp.ge.s32.totalorder %s33_s20, 2  ;;  %p52_p2 = scmp.eq.s32.totalorder %s1437_s19, 0 }
   0x5   : > { %s44_s22 = sadd.s32 1, %s1425_s16  ;;  %p1290_p5 = scmp.ge.s32.totalorder %s1437_s19, 2 }
   0x6   : > { %s1663_s20 = smov (%p35_p0, %s33_s20), 0  ;;  %p53_p3 = por %p52_p2, %p51_p1 }
   0x7   : > { %s39_s21 = ssub.s32 %s1433_s18, %s1663_s20  ;;  %195 = sbr.rel (%p1290_p5) target bundleno = 21 (0x15), region = 16 }
   0x8   : > { %p42_p4 = scmp.eq.s32.totalorder %s39_s21, 0 }
   0xa   : > { %s1501_s23 = scalar_select %p42_p4, %s1425_s16, %s44_s22  }
   0xe   : > { %198 = sbr.rel (!%p53_p3) target bundleno = 21 (0x15), region = 20  ;;  %s200_s24 = sand.u32 (%p53_p3), 1, %s1425_s16  }
   0xf   : > { %s1291_s25 = sshll.u32 (%p53_p3), %s1433_s18, 2  ;;  %s1355_s26 = smul.u32 (%p53_p3), 12, %s200_s24 }
  0x10   : > { %s206_s29 = scalar_lea.vmem (%p53_p3), %s1653_s0, %s1291_s25 }
  0x11   : > { %v222_v0 = vld [vmem:[%s206_s29] sm:$0xf] (%p53_p3)  ;;  %v224_v1 = vld [vmem:[%s206_s29 + $0x8] sm:$0xf] (%p53_p3)  ;;  %v226_v2 = vld [vmem:[%s206_s29 + $0x10] sm:$0xf] (%p53_p3) }
  0x12   : > { %s202_s30 = scalar_lea.vmem (%p53_p3), [#allocation2], %s1355_s26 }
  0x13   : > { %223 = vst [vmem:[%s202_s30] sm:$0xf] (%p53_p3), %v222_v0  ;;  %225 = vst [vmem:[%s202_s30 + $0x4] sm:$0xf] (%p53_p3), %v224_v1 }
  0x14   : > { %227 = vst [vmem:[%s202_s30 + $0x8] sm:$0xf] (%p53_p3), %v226_v2 }
  0x15 PF: > { %p1292_p6 = scmp.ge.s32.totalorder %s1437_s19, 1  ;;  %p290_p7 = scmp.lt.s32.totalorder %s1437_s19, 3 }
  0x17   : > { %p291_p8 = pnand %p1292_p6, %p290_p7 }
  0x18   : > { %s297_s5 = sand.u32 (!%p291_p8), 1, %s1421_s15   ;;  %p349_p9 = scmp.lt.s32.totalorder (!%p291_p8), %s1429_s17, 1  ;;  %v1439_v3 = vmov (!%p291_p8), 0.0   ;;  %vm1440_vm0 = vmmov (!%p291_p8), 0   ;;  %vm403_vm1 = vcmask (!%p291_p8), 1041409   ;;  %vm406_vm2 = vcmask (!%p291_p8), 1042434  }
  0x19   : > { %294 = sbr.rel (%p291_p8) target bundleno = 282 (0x11a), region = 73  ;;  %1315 = vmatprep.subr.mxu0 (!%p291_p8), %v1439_v3  ;;  %1320 = vmatprep.subr.mxu1 (!%p291_p8), %v1439_v3  ;;  %vm412_vm3 = vcmask (!%p291_p8), 1042432   ;;  %vm385_vm4 = vcmask (!%p291_p8), 26624  }
  0x1a   : > { %s1356_s6 = smul.u32 (!%p291_p8), 12, %s297_s5  ;;  %1317 = vmatprep.mubr.msk.f32.mxu0 (!%p291_p8), %vm1440_vm0, %v1439_v3  ;;  %1322 = vmatprep.mubr.msk.f32.mxu1 (!%p291_p8), %vm1440_vm0, %v1439_v3 }
  0x1c   : > { %s1525_s11 = scalar_lea.vmem (!%p291_p8), [#allocation2], %s1356_s6 }
  0x1d   : > { %v388_v4 = vld [vmem:[%s1525_s11] sm:$0x1] (!%p291_p8)  ;;  %v389_v5 = vld [vmem:[%s1525_s11 + $0x4] sm:$0x1] (!%p291_p8)  ;;  %v390_v7 = vld [vmem:[%s1525_s11 + $0x8] sm:$0x1] (!%p291_p8) }
  0x1e   : > { %v391_v8 = vunpack.c.l.bf16 (!%p291_p8), %v388_v4  ;;  %v392_v9 = vunpack.c.l.bf16 (!%p291_p8), %v389_v5  ;;  %v584_v10 = vld [vmem:[%s1525_s11] sm:$0x2] (!%p291_p8)  ;;  %v393_v11 = vunpack.c.l.bf16 (!%p291_p8), %v390_v7  ;;  %v585_v27 = vld [vmem:[%s1525_s11 + $0x4] sm:$0x2] (!%p291_p8)  ;;  %v586_v28 = vld [vmem:[%s1525_s11 + $0x8] sm:$0x2] (!%p291_p8) }
  0x1f   : > { %v587_v14 = vunpack.c.l.bf16 (!%p291_p8), %v584_v10  ;;  %v588_v41 = vunpack.c.l.bf16 (!%p291_p8), %v585_v27  ;;  %v589_v42 = vunpack.c.l.bf16 (!%p291_p8), %v586_v28  ;;  %v773_v51 = vld [vmem:[%s1525_s11] sm:$0x4] (!%p291_p8)  ;;  %v774_v56 = vld [vmem:[%s1525_s11 + $0x4] sm:$0x4] (!%p291_p8)  ;;  %v775_v61 = vld [vmem:[%s1525_s11 + $0x8] sm:$0x4] (!%p291_p8) }
  0x20   : > { %s1665_s17 = smov (!%p349_p9, %s1429_s17), 1  ;;  %v423_v17 = vrot.slane %v391_v8, 1  ;;  %v402_v18 = vrot.slane %v392_v9, 7  ;;  %v425_v19 = vrot.slane %v393_v11, 7  ;;  %v405_v20 = vrot.slane %v393_v11, 6 }
  0x21   : > { %s1520_s7 = sshll.u32 %s1665_s17, 2  ;;  %s372_s10 = scalar_lea.vmem %s1656_s3, %s1665_s17  ;;  %v598_v49 = vrot.slane %v587_v14, 2  ;;  %v599_v50 = vrot.slane %v588_v41, 1  ;;  %v689_v52 = vrot.slane %v587_v14, 3  ;;  %v690_v53 = vrot.slane %v588_v41, 2 }
  0x22   : > { %s1533_s14 = scalar_lea.vmem %s1654_s1, %s1520_s7  ;;  %s1539_s22 = scalar_lea.vmem %s1655_s2, %s1520_s7  ;;  %v1541_v6 = vld [vmem:[%s372_s10] ss:$0 sm:$0xff]  ;;  %v424_v24 = vsel %vm403_vm1, %v392_v9, %v423_v17  ;;  %v404_v25 = vsel %vm403_vm1, %v402_v18, %v391_v8  ;;  %v692_v54 = vrot.slane %v589_v42, 1  ;;  %v776_v4 = vunpack.c.l.bf16 %v773_v51 }
  0x23   : > { %v394_v12 = vld [vmem:[%s1533_s14] sm:$0x1]  ;;  %v420_v21 = vmul.f32 %v1541_v6, %v391_v8  ;;  %v421_v22 = vmul.f32 %v1541_v6, %v392_v9  ;;  %v422_v26 = vmul.f32 %v1541_v6, %v393_v11  ;;  %v426_v29 = vsel %vm406_vm2, %v425_v19, %v424_v24  ;;  %v590_v33 = vld [vmem:[%s1533_s14] sm:$0x2]  ;;  %v779_v62 = vld [vmem:[%s1533_s14] sm:$0x4]  ;;  %s380_s25 = scalar_lea.vmem %s1657_s4, %s1520_s7 }
  0x24   : > { %v396_v13 = vld [vmem:[%s1539_s22] sm:$0x1]  ;;  %v395_v15 = vunpack.c.l.bf16 %v394_v12  ;;  %v407_v30 = vsel %vm406_vm2, %v405_v20, %v404_v25  ;;  %v592_v38 = vld [vmem:[%s1539_s22] sm:$0x2]  ;;  %v591_v47 = vunpack.c.l.bf16 %v590_v33  ;;  %v607_v55 = vmul.f32 %v1541_v6, %v587_v14  ;;  %v781_v63 = vld [vmem:[%s1539_s22] sm:$0x4] }
  0x25   : > { %v397_v16 = vunpack.c.l.bf16 %v396_v13  ;;  %v434_v31 = vrot.slane %v420_v21, 1  ;;  %v509_v32 = vrot.slane %v421_v22, 7  ;;  %v436_v36 = vrot.slane %v422_v26, 7  ;;  %386 = vst.msk [vmem:[%s380_s25] sm:$0x7] %vm385_vm4, %v1439_v3 }
  0x26   : > { %v511_v37 = vrot.slane %v422_v26, 6  ;;  %v593_v48 = vunpack.c.l.bf16 %v592_v38  ;;  %v600_v58 = vsel %vm403_vm1, %v599_v50, %v598_v49  ;;  %v608_v59 = vmul.f32 %v1541_v6, %v588_v41  ;;  %v972_v41 = vld [vmem:[%s1533_s14] sm:$0x8] }
  0x27   : > { %v398_v23 = vsub.f32 %v395_v15, %v397_v16  ;;  %v435_v39 = vsel %vm403_vm1, %v421_v22, %v434_v31  ;;  %v510_v40 = vsel %vm403_vm1, %v509_v32, %v420_v21  ;;  %v609_v60 = vmul.f32 %v1541_v6, %v589_v42 }
  0x28   : > { %v437_v45 = vsel %vm406_vm2, %v436_v36, %v435_v39  ;;  %v512_v46 = vsel %vm406_vm2, %v511_v37, %v510_v40  ;;  %v594_v57 = vsub.f32 %v591_v47, %v593_v48  ;;  %v601_v0 = vsel %vm406_vm2, %v589_v42, %v600_v58  ;;  %v968_v36 = vld [vmem:[%s1525_s11 + $0x8] sm:$0x8]  ;;  %v974_v42 = vld [vmem:[%s1539_s22] sm:$0x8] }
  0x29   : > { %v428_v34 = vrot.slane %v398_v23, 6  ;;  %v410_v35 = vrot.slane %v398_v23, 5  ;;  %v691_v1 = vsel %vm403_vm1, %v690_v53, %v689_v52  ;;  %v613_v2 = vrot.slane %v607_v55, 2 }
  0x2a   : > { %v604_v5 = vrot.slane %v594_v57, 7  ;;  %v693_v7 = vsel %vm406_vm2, %v692_v54, %v691_v1  ;;  %v614_v8 = vrot.slane %v608_v59, 1  ;;  %v777_v9 = vunpack.c.l.bf16 %v774_v56 }
  0x2b   : > { %v430_v43 = vsel %vm412_vm3, %v426_v29, %v428_v34  ;;  %v413_v44 = vsel %vm412_vm3, %v407_v30, %v410_v35  ;;  %v695_v10 = vsel %vm412_vm3, %v693_v7, %v594_v57  ;;  %v778_v11 = vunpack.c.l.bf16 %v775_v61  ;;  %v966_v30 = vld [vmem:[%s1525_s11] sm:$0x8]  ;;  %v967_v35 = vld [vmem:[%s1525_s11 + $0x4] sm:$0x8] }
  0x2c   : > { %1316 = vmatpush3.xpose.msra.mxu0 %v430_v43  ;;  %1321 = vmatpush3.xpose.msra.mxu1 %v413_v44  ;;  %v780_v12 = vunpack.c.l.bf16 %v779_v62  ;;  %v782_v13 = vunpack.c.l.bf16 %v781_v63  ;;  %v606_v14 = vsel %vm412_vm3, %v601_v0, %v604_v5  ;;  %v615_v15 = vsel %vm403_vm1, %v614_v8, %v613_v2 }
  0x2d   : > { %1325 = vmatprep.subr.mxu0 %v1439_v3  ;;  %1330 = vmatprep.subr.mxu1 %v1439_v3  ;;  %v787_v16 = vrot.slane %v776_v4, 4  ;;  %v788_v17 = vrot.slane %v777_v9, 3  ;;  %v616_v18 = vsel %vm406_vm2, %v609_v60, %v615_v15  ;;  %v790_v20 = vrot.slane %v778_v11, 2 }
  0x2e   : > { %v783_v19 = vsub.f32 %v780_v12, %v782_v13  ;;  %v696_v21 = vrot.slane %v607_v55, 3  ;;  %v697_v23 = vrot.slane %v608_v59, 2  ;;  %v699_v24 = vrot.slane %v609_v60, 1 }
  0x2f   : > { %1318 = vmatmul.mubr.f32.vlgmr.msra.gmra.mrb[0].mxu0 %v437_v45  ;;  %1323 = vmatmul.mubr.f32.vlgmr.msra.gmra.mrb[0].mxu1 %v512_v46  ;;  %v789_v22 = vsel %vm403_vm1, %v788_v17, %v787_v16  ;;  %v880_v25 = vrot.slane %v776_v4, 5  ;;  %v881_v28 = vrot.slane %v777_v9, 4  ;;  %v883_v29 = vrot.slane %v778_v11, 3 }
  0x30   : > { %1327 = vmatprep.mubr.msk.f32.mxu0 %vm1440_vm0, %v1439_v3  ;;  %1332 = vmatprep.mubr.msk.f32.mxu1 %vm1440_vm0, %v1439_v3  ;;  %v791_v26 = vsel %vm406_vm2, %v790_v20, %v789_v22  ;;  %v794_v27 = vrot.slane %v783_v19, 1  ;;  %v698_v31 = vsel %vm403_vm1, %v697_v23, %v696_v21  ;;  %v886_v32 = vrot.slane %v783_v19, 2 }
  0x31   : > { %1331 = vmatpush3.xpose.msra.mxu1 %v695_v10  ;;  %1326 = vmatpush3.xpose.msra.mxu0 %v606_v14  ;;  %v797_v33 = vmul.f32 %v1541_v6, %v776_v4  ;;  %v798_v34 = vmul.f32 %v1541_v6, %v777_v9  ;;  %v700_v38 = vsel %vm406_vm2, %v699_v24, %v698_v31  ;;  %v969_v46 = vunpack.c.l.bf16 %v966_v30 }
  0x32   : > { %1340 = vmatprep.subr.mxu1 %v1439_v3  ;;  %1335 = vmatprep.subr.mxu0 %v1439_v3  ;;  %v796_v37 = vsel %vm412_vm3, %v791_v26, %v794_v27  ;;  %v882_v39 = vsel %vm403_vm1, %v881_v28, %v880_v25  ;;  %v799_v40 = vmul.f32 %v1541_v6, %v778_v11  ;;  %v970_v49 = vunpack.c.l.bf16 %v967_v35 }
  0x33   : > { %v884_v43 = vsel %vm406_vm2, %v883_v29, %v882_v39  ;;  %v803_v44 = vrot.slane %v797_v33, 4  ;;  %v804_v45 = vrot.slane %v798_v34, 3  ;;  %v971_v50 = vunpack.c.l.bf16 %v968_v36 }
  0x34   : > { %1328 = vmatmul.mubr.f32.vlgmr.msra.gmra.mrb[2].mxu0 %v616_v18  ;;  %1333 = vmatmul.mubr.f32.vlgmr.msra.gmra.mrb[2].mxu1 %v700_v38  ;;  %v888_v47 = vsel %vm412_vm3, %v884_v43, %v886_v32  ;;  %v806_v48 = vrot.slane %v799_v40, 2  ;;  %v973_v52 = vunpack.c.l.bf16 %v972_v41  ;;  %v975_v53 = vunpack.c.l.bf16 %v974_v42 }
  0x35   : > { %1337 = vmatprep.mubr.msk.f32.mxu0 %vm1440_vm0, %v1439_v3  ;;  %1336 = vmatpush3.xpose.msra.mxu0 %v796_v37  ;;  %v805_v51 = vsel %vm403_vm1, %v804_v45, %v803_v44  ;;  %v980_v54 = vrot.slane %v969_v46, 6  ;;  %v981_v56 = vrot.slane %v970_v49, 5  ;;  %v983_v57 = vrot.slane %v971_v50, 4 }
  0x36   : > { %1345 = vmatprep.subr.mxu0 %v1439_v3  ;;  %1342 = vmatprep.mubr.msk.f32.mxu1 %vm1440_vm0, %v1439_v3  ;;  %v807_v55 = vsel %vm406_vm2, %v806_v48, %v805_v51  ;;  %v889_v58 = vrot.slane %v797_v33, 5  ;;  %v976_v59 = vsub.f32 %v973_v52, %v975_v53  ;;  %v890_v60 = vrot.slane %v798_v34, 4 }
  0x37   : > { %1341 = vmatpush3.xpose.msra.mxu1 %v888_v47  ;;  %v892_v61 = vrot.slane %v799_v40, 3  ;;  %v1073_v62 = vrot.slane %v969_v46, 7  ;;  %v982_v63 = vsel %vm403_vm1, %v981_v56, %v980_v54  ;;  %v1074_v0 = vrot.slane %v970_v49, 6 }
  0x38   : > { %1350 = vmatprep.subr.mxu1 %v1439_v3  ;;  %1338 = vmatmul.mubr.f32.vlgmr.msra.gmra.mrb[4].mxu0 %v807_v55  ;;  %v1076_v1 = vrot.slane %v971_v50, 5  ;;  %v990_v2 = vmul.f32 %v1541_v6, %v969_v46  ;;  %v984_v4 = vsel %vm406_vm2, %v983_v57, %v982_v63  ;;  %v987_v5 = vrot.slane %v976_v59, 3  ;;  %v1159_v46 = vld [vmem:[%s380_s25] sm:$0x7] }
  0x39   : > { %1347 = vmatprep.mubr.msk.f32.mxu0 %vm1440_vm0, %v1439_v3  ;;  %v891_v7 = vsel %vm403_vm1, %v890_v60, %v889_v58  ;;  %v1079_v8 = vrot.slane %v976_v59, 4  ;;  %v1075_v10 = vsel %vm403_vm1, %v1074_v0, %v1073_v62  ;;  %v991_v11 = vmul.f32 %v1541_v6, %v970_v49 }
  0x3a   : > { %v893_v9 = vsel %vm406_vm2, %v892_v61, %v891_v7  ;;  %v992_v12 = vmul.f32 %v1541_v6, %v971_v50  ;;  %v989_v13 = vsel %vm412_vm3, %v984_v4, %v987_v5  ;;  %v1077_v14 = vsel %vm406_vm2, %v1076_v1, %v1075_v10 }
  0x3b   : > { %1343 = vmatmul.mubr.f32.vlgmr.msra.gmra.mrb[4].mxu1 %v893_v9  ;;  %v996_v15 = vrot.slane %v990_v2, 6  ;;  %v1082_v16 = vrot.slane %v990_v2, 7  ;;  %1346 = vmatpush3.xpose.msra.mxu0 %v989_v13  ;;  %v1081_v17 = vsel %vm412_vm3, %v1077_v14, %v1079_v8  ;;  %v997_v18 = vrot.slane %v991_v11, 5 }
  0x3c   : > { %v999_v19 = vrot.slane %v992_v12, 4  ;;  %1352 = vmatprep.mubr.msk.f32.mxu1 %vm1440_vm0, %v1439_v3  ;;  %v1083_v20 = vrot.slane %v991_v11, 6  ;;  %1351 = vmatpush3.xpose.msra.mxu1 %v1081_v17  ;;  %v1085_v21 = vrot.slane %v992_v12, 5 }
  0x3d   : > { %v998_v6 = vsel %vm403_vm1, %v997_v18, %v996_v15 }
  0x3e   : > { %v1084_v22 = vsel %vm403_vm1, %v1083_v20, %v1082_v16  ;;  %v1000_v23 = vsel %vm406_vm2, %v999_v19, %v998_v6 }
  0x3f   : > { %v1086_v24 = vsel %vm406_vm2, %v1085_v21, %v1084_v22  ;;  %1348 = vmatmul.mubr.f32.vlgmr.msra.gmra.mrb[6].mxu0 %v1000_v23 }
  0x40   : > { %1353 = vmatmul.mubr.f32.vlgmr.msra.gmra.mrb[6].mxu1 %v1086_v24 }
 0x102   : > { %v505_v25 = vpop.f32.mrb[0].mxu0  ;;  %v580_v26 = vpop.f32.mrb[0].mxu1 }
 0x103   : > { %v1319_v27 = vpop.f32.mrb[1].mxu0  ;;  %v581_v28 = vadd.f32 %v580_v26, %v505_v25  ;;  %v1324_v29 = vpop.f32.mrb[1].mxu1 }
 0x107   : > { %v684_v30 = vpop.f32.mrb[2].mxu0  ;;  %v768_v33 = vpop.f32.mrb[2].mxu1 }
 0x108   : > { %v688_v31 = vadd.f32 %v684_v30, %v581_v28  ;;  %v1329_v32 = vpop.f32.mrb[3].mxu0  ;;  %v1334_v35 = vpop.f32.mrb[3].mxu1 }
 0x10a   : > { %v772_v34 = vadd.f32 %v768_v33, %v688_v31 }
 0x10b   : > { %v875_v36 = vpop.f32.mrb[4].mxu0 }
 0x10c   : > { %v879_v37 = vadd.f32 %v875_v36, %v772_v34  ;;  %v1339_v38 = vpop.f32.mrb[5].mxu0 }
 0x10e   : > { %v961_v39 = vpop.f32.mrb[4].mxu1 }
 0x10f   : > { %v965_v40 = vadd.f32 %v961_v39, %v879_v37  ;;  %v1344_v41 = vpop.f32.mrb[5].mxu1 }
 0x112   : > { %v1068_v42 = vpop.f32.mrb[6].mxu0 }
 0x113   : > { %v1154_v43 = vpop.f32.mrb[6].mxu1  ;;  %v1072_v3 = vadd.f32 %v1068_v42, %v965_v40  ;;  %v1349_v44 = vpop.f32.mrb[7].mxu0 }
 0x114   : > { %v1354_v45 = vpop.f32.mrb[7].mxu1 }
 0x115   : > { %v1158_v47 = vadd.f32 %v1154_v43, %v1072_v3 }
 0x117   : > { %v1160_v48 = vadd.f32 %v1159_v46, %v1158_v47 }
 0x119   : > { %1162 = vst.msk [vmem:[%s380_s25] sm:$0x7] %vm385_vm4, %v1160_v48 }
 0x11a PF: > { %s14_s19 = sadd.s32 1, %s1437_s19   ;;  %s1658_s15 = smov %s1425_s16 }
 0x11b   : > { %p11_p10 = scmp.ge.s32.totalorder %s14_s19, 4   ;;  %s1659_s16 = smov %s1501_s23 }
 0x11c   : > { %s1660_s17 = smov %s1433_s18  ;;  %s1661_s18 = smov %s1663_s20 }
 0x11d   :  { %13 = sbr.rel (!%p11_p10) target bundleno = 3 (0x3), region = 125 }

// kernel: custom-call.99
= control target key start
LH: loop header
LB: loop body
LE: loop exit
PB: predicated region body
PF: predicated region fallthrough
CT: control target
= control target key end

     0   :  { %s343_s6 = smov 0   ;;  %s345_s7 = smov 0   ;;  %s390_s0 = inlined_call_operand.vmem [shape: f32[2,1,3,3], index: 0, kind: input, shape index: {}]   ;;  %s391_s1 = inlined_call_operand.vmem [shape: f32[2,1,3,3], index: 1, kind: output, shape index: {}]  }
   0x1   :  { %s347_s8 = smov 0  }
   0x2 LB: > { %s269_s9 = sadd.s32 4294967295, %s330_s8   ;;  %s33_s10 = sadd.s32 1, %s326_s7  ;;  %s330_s8 = sphi %s347_s8, %s7_s8   ;;  %s326_s7 = sphi %s345_s7, %s393_s7   ;;  %s322_s6 = sphi %s343_s6, %s392_s6  }
   0x3   : > { %p35_p0 = scmp.ge.s32.totalorder %s33_s10, 2  ;;  %p271_p1 = scmp.ge.s32.totalorder %s330_s8, 2 }
   0x4   : > { %s49_s11 = sand.u32 (!%p271_p1), 1, %s330_s8   ;;  %s273_s12 = sshll.u32 (!%p271_p1), %s326_s7, 2 }
   0x5   : > { %s395_s10 = smov (%p35_p0, %s33_s10), 0  ;;  %47 = sbr.rel (%p271_p1) target bundleno = 12 (0xc), region = 16 }
   0x6   : > { %s272_s13 = sshll.u32 (!%p271_p1), %s49_s11, 2  ;;  %s56_s16 = scalar_lea.vmem (!%p271_p1), %s390_s0, %s273_s12 }
   0x7   : > { %v72_v0 = vld [vmem:[%s56_s16] sm:$0xf] (!%p271_p1)  ;;  %s51_s17 = scalar_lea.vmem (!%p271_p1), [#allocation1], %s272_s13 }
   0x8   : > { %73 = vst [vmem:[%s51_s17] sm:$0xf] (!%p271_p1), %v72_v0 }
   0xc PF: > { %p274_p2 = scmp.ge.s32.totalorder %s330_s8, 1  ;;  %p89_p3 = scmp.lt.s32.totalorder %s330_s8, 3 }
   0xe   : > { %p90_p4 = pnand %p274_p2, %p89_p3 }
  0x10   : > { %93 = sbr.rel (%p90_p4) target bundleno = 511 (0x1ff), region = 50 }
  0x17   : > { %s370_s18 = sand.u32 1, %s269_s9   ;;  %v111_v1 = vlaneseq  ;;  %v332_v11 = vmov -1.0   ;;  %s278_s22 = sshll.u32 %s322_s6, 2 }
  0x18   : > { %s275_s19 = sshll.u32 %s370_s18, 2  ;;  %s178_s25 = scalar_lea.vmem %s391_s1, %s278_s22 }
  0x19   : > { %s102_s20 = scalar_lea.vmem [#allocation1], %s275_s19  ;;  %v112_v3 = vand.u32 127, %v111_v1  ;;  %v115_v4 = vshrl.u32 %v111_v1, 7  ;;  %s106_s21 = scalar_lea.vmem [#allocation3], %s275_s19 }
  0x1a   : > { %v109_v2 = vld [vmem:[%s102_s20] sm:$0xf] }
  0x1b   : > { %110 = vst [vmem:[#allocation0] sm:$0xf] %v109_v2  ;;  %vm113_vm0 = vcmp.lt.s32.totalorder %v112_v3, 3  ;;  %vm122_vm1 = vcmp.ge.s32.totalorder %v115_v4, %v112_v3  ;;  %vm117_vm2 = vcmp.eq.s32.totalorder %v115_v4, %v112_v3  ;;  %vm136_vm4 = vcmp.eq.s32.totalorder %v112_v3, 0 }
  0x1c   : > { %vm123_vm3 = vmand %vm122_vm1, %vm113_vm0  ;;  %vm133_vm5 = vcmp.eq.s32.totalorder %v112_v3, %v115_v4  ;;  %v137_v12 = vsel %vm136_vm4, 1.0, %v332_v11  ;;  %vm144_vm6 = vcmp.eq.s32.totalorder %v112_v3, 1  ;;  %vm154_vm7 = vcmp.eq.s32.totalorder %v112_v3, 2 }
  0x1d   : > { %v138_v13 = vsel %vm133_vm5, %v137_v12, 0.0 }
  0x22   : > { %v118_v5 = vld [vmem:[#allocation0] sm:$0xff] }
  0x23   : > { %v119_v6 = vsel %vm117_vm2, %v118_v5, 0.0  ;;  %v124_v7 = vsel %vm123_vm3, %v118_v5, 0.0 }
  0x24   : > { %120 = vadd.xlane.f32.xlu0 %v119_v6 }
  0xb1   : > { %v121_v8 = vpop.xlane.xlu0 %120 }
  0xb2   : > { %306 = vrcp.f32 %v121_v8  ;;  %vm161_vm8 = vweird.f32 %v121_v8 }
  0xbc   : > { %v307_v9 = vpop.eup %306 }
  0xbd   : > { %v126_v10 = vmul.f32 %v307_v9, %v124_v7 }
  0xbf   : > { %127 = vst [vmem:[#allocation4] sm:$0xff] %v126_v10 }
  0xc6   : > { %v140_v14 = vld [vmem:[#allocation4 + $0x1] ss:$0 sm:$0xff]  ;;  %v150_v17 = vld [vmem:[#allocation4 + $0x2] ss:$0 sm:$0xff] }
  0xc7   : > { %v141_v15 = vxor.u32 2147483648, %v140_v14  ;;  %v151_v19 = vxor.u32 2147483648, %v150_v17 }
  0xc9   : > { %v145_v16 = vmul.f32 %v141_v15, %v138_v13 }
  0xcb   : > { %146 = vadd.xlane.f32.xlu0 %v145_v16 }
 0x158   : > { %v147_v18 = vpop.xlane.xlu0 %146 }
 0x159   : > { %v148_v20 = vsel %vm144_vm6, %v147_v18, %v138_v13 }
 0x15a   : > { %v155_v21 = vmul.f32 %v151_v19, %v148_v20 }
 0x15c   : > { %156 = vadd.xlane.f32.xlu1 %v155_v21 }
 0x1e9   : > { %v157_v22 = vpop.xlane.xlu1 %156 }
 0x1ea   : > { %v158_v23 = vsel %vm154_vm7, %v157_v22, %v148_v20 }
 0x1eb   : > { %v160_v24 = vmul.f32 %v307_v9, %v158_v23 }
 0x1ed   : > { %v162_v25 = vsel %vm161_vm8, %v158_v23, %v160_v24 }
 0x1ee   : > { %163 = vst [vmem:[#allocation2] sm:$0xff] %v162_v25 }
 0x1f5   : > { %v167_v26 = vld [vmem:[#allocation2] sm:$0xf] }
 0x1f6   : > { %169 = vst [vmem:[%s106_s21] sm:$0xf] %v167_v26 }
 0x1fd   : > { %v194_v27 = vld [vmem:[%s106_s21] sm:$0xf] }
 0x1fe   : > { %195 = vst [vmem:[%s178_s25] sm:$0xf] %v194_v27 }
 0x1ff PF: > { %s7_s8 = sadd.s32 1, %s330_s8   ;;  %s392_s6 = smov %s326_s7 }
 0x200   : > { %p4_p5 = scmp.ge.s32.totalorder %s7_s8, 4   ;;  %s393_s7 = smov %s395_s10 }
 0x202   :  { %6 = sbr.rel (!%p4_p5) target bundleno = 2 (0x2), region = 112 }

</bundles_post_ra>
